<compile_context>
chip_gen: v7x
topology: tpu7x:2x2x1
jax: 0.10.0
libtpu: 0.0.40
codegen_flags: <defaults>
</compile_context>

<pallas_src>
import math

import jax
import jax.numpy as jnp
from jax.experimental import pallas as pl
from jax.experimental.pallas import tpu as pltpu

NEG_SLOPE = 0.01      # torch.nn.LeakyReLU default negative slope
BRANCH_IN = 100       # branch_input_size
TRUNK_IN = 1          # trunk_input_size
HIDDEN = 8            # all hidden_neurons = [8, 8, 8]
NUM_BASIS = 10        # num_basis_functions
LANES = 128

# ---- fused bf16 weight slab row offsets (all 16-aligned for bf16 packing) ---
R_L1 = 0       # (100, 128) fused shift/scale/branch first layer
R_L2 = 112     # (128, 128) fused hidden layer 1 (+ bias-net hidden 1)
R_L3 = 240     # (128, 128) fused hidden layer 2 (+ bias-net hidden 2)
R_L4 = 368     # (128, 128) fused output layer   (+ bias-net output)
R_T1 = 496     # ( 16, 128) trunk first layer, scattered per basis slot
R_T2 = 512     # (128, 128) trunk hidden layer 1 (block diagonal)
R_T3 = 640     # (128, 128) trunk hidden layer 2 (block diagonal)
R_T4 = 768     # (128, 128) trunk output layer with diagonal selection folded in
W_ROWS = 896

# ---- f32 bias / aux slab rows ----------------------------------------------
RB_L1, RB_L2, RB_L3, RB_L4 = 0, 1, 2, 3
RB_ZW, RB_MASK = 4, 5                 # bias-net layer-1 weight row; residual mask
RB_T1, RB_T2, RB_T3, RB_T4 = 6, 7, 8, 9
B_ROWS = 16

BIAS_COL = 48         # fo column holding the bias-net scalar output

_CONTRACT_LAST = (((1,), (1,)), ((), ()))   # contract last dims of both operands


def _round_up(x, m):
    return (x + m - 1) // m * m


def _act(x):
    return jnp.where(x > 0, x, NEG_SLOPE * x)


# --------------------------------- kernel ----------------------------------

def shift_deeponet_kernel(xb_ref, xt_ref, w_ref, b_ref, out_ref):
    f32, bf16 = jnp.float32, jnp.bfloat16

    xb = xb_ref[...].astype(bf16)          # (TB, 100) — bf16 MXU operands
    xt = xt_ref[...]                       # (TB, 1)   — f32
    bb = b_ref[...]                        # (16, 128) — f32 biases / aux rows

    def mm(lhs, r0, rows):                 # bf16 x bf16 -> f32 accumulate
        return jnp.dot(lhs, w_ref[r0:r0 + rows, :], preferred_element_type=f32)

    # ---- fused shift/scale/branch BranchNets + bias NeuralNet --------------
    # hidden columns: shift 0:8 | scale 8:16 | branch 16:24 | bias-net 24:32
    h1 = _act(mm(xb, R_L1, BRANCH_IN)
              + xt * bb[RB_ZW:RB_ZW + 1, :]        # bias-net layer 1 (scalar in)
              + bb[RB_L1:RB_L1 + 1, :])
    h = _act(mm(h1.astype(bf16), R_L2, LANES) + bb[RB_L2:RB_L2 + 1, :])
    h = _act(mm(h.astype(bf16), R_L3, LANES) + bb[RB_L3:RB_L3 + 1, :])
    h = h + h1 * bb[RB_MASK:RB_MASK + 1, :]        # BranchNet residual (cols 0:24 only)
    fo = mm(h.astype(bf16), R_L4, LANES) + bb[RB_L4:RB_L4 + 1, :]
    # fo columns: 0:10 shift | 16:26 scale | 32:42 branch | 48 bias-net output

    # ---- shifted / scaled trunk coordinates, one per basis function --------
    t16 = xt * fo[:, 16:32] + fo[:, 0:16]          # (TB, 16); cols 10:16 stay 0

    # ---- trunk NeuralNet for all 10 basis slots at once (block-diagonal),
    #      diagonal extraction folded into the output weights ----------------
    ht = _act(mm(t16.astype(bf16), R_T1, 16) + bb[RB_T1:RB_T1 + 1, :])
    ht = _act(mm(ht.astype(bf16), R_T2, LANES) + bb[RB_T2:RB_T2 + 1, :])
    ht = _act(mm(ht.astype(bf16), R_T3, LANES) + bb[RB_T3:RB_T3 + 1, :])
    diag = mm(ht.astype(bf16), R_T4, LANES) + bb[RB_T4:RB_T4 + 1, :]   # cols 0:10

    # ---- sum(branch * diag)/sqrt(K) + bias, emitted lane-dense as (1, TB) ---
    inv = 1.0 / math.sqrt(NUM_BASIS)
    red = fo[:, 32:42] * diag[:, 0:NUM_BASIS] + fo[:, BIAS_COL:BIAS_COL + 1] * inv
    ones_inv = jnp.full((1, NUM_BASIS), inv, f32)
    out_ref[...] = jax.lax.dot_general(ones_inv, red, _CONTRACT_LAST,
                                       preferred_element_type=f32)     # (1, TB)


# -------------------------------- wrapper ----------------------------------

def shift_deeponet(x_branch, x_trunk, packed, *, block_batch=512):
    """packed = pack_params(params).  block_batch is sweepable (256/512/1024);
    the batch tile is a multiple of 128 so the (1, tb) output block stays
    lane-dense, and for small B it targets ~2 balanced grid steps (v7x)."""
    W, Bs = packed
    B = x_branch.shape[0]
    assert x_branch.shape[1] == BRANCH_IN and x_trunk.shape[1] == TRUNK_IN

    tb = max(128, min(_round_up(block_batch, 128),
                      _round_up(pl.cdiv(B, 2), 128)))
    grid = (pl.cdiv(B, tb),)

    # No padded copy: raw inputs go straight into the kernel; the ragged last
    # tile (if any) reads garbage rows whose outputs are dropped/sliced off.
    xb = x_branch.astype(jnp.float32)      # (B, 100)
    xt = x_trunk.astype(jnp.float32)       # (B, 1)

    out = pl.pallas_call(
        shift_deeponet_kernel,
        out_shape=jax.ShapeDtypeStruct((1, B), jnp.float32),
        grid=grid,
        in_specs=[
            pl.BlockSpec((tb, BRANCH_IN), lambda i: (i, 0)),   # x_branch tile
            pl.BlockSpec((tb, TRUNK_IN), lambda i: (i, 0)),    # x_trunk tile
            pl.BlockSpec(W.shape, lambda i: (0, 0)),           # bf16 weight slab
            pl.BlockSpec(Bs.shape, lambda i: (0, 0)),          # f32 bias/aux slab
        ],
        out_specs=pl.BlockSpec((1, tb), lambda i: (0, i)),     # lane-dense output row
        compiler_params=pltpu.CompilerParams(
            dimension_semantics=("parallel",)),
    )(xb, xt, W, Bs)

    return out.reshape(B, 1)


# -------------------- deterministic parameter construction -----------------

def make_params(key):
    def init_linear(k, fan_in, fan_out):
        kw, kb = jax.random.split(k)
        bound = 1.0 / math.sqrt(fan_in)
        w = jax.random.uniform(kw, (fan_in, fan_out), jnp.float32, -bound, bound)
        b = jax.random.uniform(kb, (1, fan_out), jnp.float32, -bound, bound)
        return [w, b]

    dims_branch_like = [(BRANCH_IN, HIDDEN), (HIDDEN, HIDDEN),
                        (HIDDEN, HIDDEN), (HIDDEN, NUM_BASIS)]
    dims_bias = [(TRUNK_IN, HIDDEN), (HIDDEN, HIDDEN),
                 (HIDDEN, HIDDEN), (HIDDEN, TRUNK_IN)]
    dims_trunk = [(TRUNK_IN, HIDDEN), (HIDDEN, HIDDEN),
                  (HIDDEN, HIDDEN), (HIDDEN, NUM_BASIS)]

    keys = jax.random.split(key, 20)
    params, ki = [], 0
    # order: shift_net, scale_net, branch_net, bias_net, trunk_net
    for dims in (dims_branch_like, dims_branch_like, dims_branch_like,
                 dims_bias, dims_trunk):
        for fi, fo in dims:
            params += init_linear(keys[ki], fi, fo)
            ki += 1
    return params


def pack_params(params):
    """Pack the 40 per-layer tensors into 2 kernel-friendly slabs:
    a (896, 128) bf16 weight slab and a (16, 128) f32 bias/aux slab."""
    p = params
    shift_p, scale_p, branch_p, bias_p, trunk_p = (
        p[0:8], p[8:16], p[16:24], p[24:32], p[32:40])
    H, K = HIDDEN, NUM_BASIS

    W = jnp.zeros((W_ROWS, LANES), jnp.float32)
    Bs = jnp.zeros((B_ROWS, LANES), jnp.float32)

    # fused shift / scale / branch BranchNets: hidden cols n*8:(n+1)*8,
    # output cols n*16:n*16+10
    for n, q in enumerate((shift_p, scale_p, branch_p)):
        w1, b1, w2, b2, w3, b3, w4, b4 = q
        c, oc = n * H, n * 16
        W = W.at[R_L1:R_L1 + BRANCH_IN, c:c + H].set(w1)
        W = W.at[R_L2 + c:R_L2 + c + H, c:c + H].set(w2)
        W = W.at[R_L3 + c:R_L3 + c + H, c:c + H].set(w3)
        W = W.at[R_L4 + c:R_L4 + c + H, oc:oc + K].set(w4)
        Bs = Bs.at[RB_L1, c:c + H].set(b1[0])
        Bs = Bs.at[RB_L2, c:c + H].set(b2[0])
        Bs = Bs.at[RB_L3, c:c + H].set(b3[0])
        Bs = Bs.at[RB_L4, oc:oc + K].set(b4[0])

    # bias NeuralNet folded into hidden columns 24:32 / output column 48
    w1, b1, w2, b2, w3, b3, w4, b4 = bias_p
    c = 3 * H
    Bs = Bs.at[RB_ZW, c:c + H].set(w1[0])       # layer-1 weights (scalar input)
    Bs = Bs.at[RB_L1, c:c + H].set(b1[0])
    W = W.at[R_L2 + c:R_L2 + c + H, c:c + H].set(w2)
    Bs = Bs.at[RB_L2, c:c + H].set(b2[0])
    W = W.at[R_L3 + c:R_L3 + c + H, c:c + H].set(w3)
    Bs = Bs.at[RB_L3, c:c + H].set(b3[0])
    W = W.at[R_L4 + c:R_L4 + c + H, BIAS_COL:BIAS_COL + 1].set(w4)
    Bs = Bs.at[RB_L4, BIAS_COL].set(b4[0, 0])

    # BranchNet residual applies only to the shift/scale/branch hidden columns
    Bs = Bs.at[RB_MASK, 0:3 * H].set(1.0)

    # trunk NeuralNet, vectorized over the 10 basis slots, diagonal folded in
    w1, b1, w2, b2, w3, b3, w4, b4 = trunk_p
    for k in range(K):
        r = k * H
        W = W.at[R_T1 + k, r:r + H].set(w1[0])
        W = W.at[R_T2 + r:R_T2 + r + H, r:r + H].set(w2)
        W = W.at[R_T3 + r:R_T3 + r + H, r:r + H].set(w3)
        W = W.at[R_T4 + r:R_T4 + r + H, k].set(w4[:, k])   # diagonal selection
        Bs = Bs.at[RB_T1, r:r + H].set(b1[0])
        Bs = Bs.at[RB_T2, r:r + H].set(b2[0])
        Bs = Bs.at[RB_T3, r:r + H].set(b3[0])
    Bs = Bs.at[RB_T4, 0:K].set(b4[0])

    return W.astype(jnp.bfloat16), Bs


# ------------------------------ JAX reference -------------------------------

def reference(x_branch, x_trunk, params):
    p = params
    shift_p, scale_p, branch_p, bias_p, trunk_p = (
        p[0:8], p[8:16], p[16:24], p[24:32], p[32:40])

    def lin(x, w, b):
        return x @ w + b

    def act(x):
        return jnp.where(x > 0, x, NEG_SLOPE * x)

    def branch(x, q):
        h = act(lin(x, q[0], q[1]))
        h_in = h
        h = act(lin(h, q[2], q[3]))
        h = act(lin(h, q[4], q[5]))
        h = h + h_in
        return lin(h, q[6], q[7])

    def neural(x, q):
        h = act(lin(x, q[0], q[1]))
        h = act(lin(h, q[2], q[3]))
        h = act(lin(h, q[4], q[5]))
        return lin(h, q[6], q[7])

    x_shift = branch(x_branch, shift_p)
    x_scale = branch(x_branch, scale_p)
    x_bias = neural(x_trunk, bias_p)
    t = x_trunk * x_scale + x_shift
    B = x_branch.shape[0]
    t = t.reshape(B * NUM_BASIS, TRUNK_IN)
    tout = neural(t, trunk_p).reshape(B, NUM_BASIS, NUM_BASIS)
    t_diag = jnp.diagonal(tout, axis1=-2, axis2=-1)
    xb = branch(x_branch, branch_p)
    return (jnp.sum(xb * t_diag, axis=1, keepdims=True)
            / jnp.sqrt(jnp.float32(NUM_BASIS)) + x_bias)


# ---------------------------------- main ------------------------------------

if __name__ == "__main__":
    key = jax.random.PRNGKey(0)
    kp, kb, kt = jax.random.split(key, 3)
    params = make_params(kp)
    packed = pack_params(params)

    # B=200 is not a tile multiple -> exercises the ragged last tile and gives
    # a 2-step parallel grid (tb=128).
    B = 200
    x_branch = jax.random.normal(kb, (B, BRANCH_IN), jnp.float32)
    x_trunk = jax.random.normal(kt, (B, TRUNK_IN), jnp.float32)

    out = shift_deeponet(x_branch, x_trunk, packed)
    out = jax.block_until_ready(out)

    ref = reference(x_branch, x_trunk, params)
    assert out.shape == (B, 1)
    err = float(jnp.max(jnp.abs(out - ref)))
    # bf16 MXU operands with f32 accumulation -> tolerance set for bf16 math.
    assert jnp.allclose(out, ref, atol=2e-2, rtol=2e-2), err
    print("KERNEL_OK")
</pallas_src>

<mosaic_0001>
module attributes {stable_mosaic.version = 11 : i64} {
  func.func @shift_deeponet_kernel(%arg0: i32, %arg1: memref<128x100xf32, #tpu.memory_space<vmem>>, %arg2: memref<128x1xf32, #tpu.memory_space<vmem>>, %arg3: memref<896x128xbf16, #tpu.memory_space<vmem>>, %arg4: memref<16x128xf32, #tpu.memory_space<vmem>>, %arg5: memref<1x128xf32, #tpu.memory_space<vmem>>) attributes {dimension_semantics = [#tpu.dimension_semantics<parallel>], iteration_bounds = array<i64: 2>, scalar_prefetch = 0 : i64, scratch_operands = 0 : i64, tpu.core_type = #tpu.core_type<tc>, window_params = [{transform_indices = @transform_0, window_bounds = array<i64: 128, 100>}, {transform_indices = @transform_1, window_bounds = array<i64: 128, 1>}, {pipeline_mode = #tpu.pipeline_mode<synchronous>, transform_indices = @transform_2, window_bounds = array<i64: 896, 128>}, {pipeline_mode = #tpu.pipeline_mode<synchronous>, transform_indices = @transform_3, window_bounds = array<i64: 16, 128>}, {transform_indices = @transform_4, window_bounds = array<i64: 1, 128>}]} {
    %c0 = arith.constant 0 : index
    %c0_0 = arith.constant 0 : index
    %0 = vector.load %arg1[%c0, %c0_0] : memref<128x100xf32, #tpu.memory_space<vmem>>, vector<128x100xf32>
    %1 = arith.truncf %0 : vector<128x100xf32> to vector<128x100xbf16>
    %c0_1 = arith.constant 0 : index
    %c0_2 = arith.constant 0 : index
    %2 = vector.load %arg2[%c0_1, %c0_2] : memref<128x1xf32, #tpu.memory_space<vmem>>, vector<128x1xf32>
    %c0_3 = arith.constant 0 : index
    %c0_4 = arith.constant 0 : index
    %3 = vector.load %arg4[%c0_3, %c0_4] : memref<16x128xf32, #tpu.memory_space<vmem>>, vector<16x128xf32>
    %c0_5 = arith.constant 0 : index
    %c0_6 = arith.constant 0 : index
    %4 = vector.load %arg3[%c0_5, %c0_6] : memref<896x128xbf16, #tpu.memory_space<vmem>>, vector<100x128xbf16>
    %cst = arith.constant dense<0.000000e+00> : vector<128x128xf32>
    %5 = tpu.matmul %1, %4, %cst {dimension_numbers = #tpu.dot_dimension_numbers<[1], [0], [0], [1], [0, 0, 1, 1], [], []>} : vector<128x100xbf16>, vector<100x128xbf16>, vector<128x128xf32> -> vector<128x128xf32>
    %6 = vector.extract_strided_slice %3 {offsets = [4, 0], sizes = [1, 128], strides = [1, 1]} : vector<16x128xf32> to vector<1x128xf32>
    %7 = vector.broadcast %2 : vector<128x1xf32> to vector<128x128xf32>
    %8 = vector.broadcast %6 : vector<1x128xf32> to vector<128x128xf32>
    %9 = arith.mulf %7, %8 : vector<128x128xf32>
    %10 = arith.addf %5, %9 : vector<128x128xf32>
    %11 = vector.extract_strided_slice %3 {offsets = [0, 0], sizes = [1, 128], strides = [1, 1]} : vector<16x128xf32> to vector<1x128xf32>
    %12 = vector.broadcast %11 : vector<1x128xf32> to vector<128x128xf32>
    %13 = arith.addf %10, %12 : vector<128x128xf32>
    %cst_7 = arith.constant 0.000000e+00 : f32
    %14 = vector.broadcast %cst_7 : f32 to vector<128x128xf32>
    %15 = arith.cmpf ogt, %13, %14 : vector<128x128xf32>
    %cst_8 = arith.constant 0.00999999977 : f32
    %16 = vector.broadcast %cst_8 : f32 to vector<128x128xf32>
    %17 = arith.mulf %16, %13 : vector<128x128xf32>
    %18 = arith.select %15, %13, %17 : vector<128x128xi1>, vector<128x128xf32>
    %19 = arith.truncf %18 : vector<128x128xf32> to vector<128x128xbf16>
    %c112 = arith.constant 112 : index
    %c0_9 = arith.constant 0 : index
    %20 = vector.load %arg3[%c112, %c0_9] : memref<896x128xbf16, #tpu.memory_space<vmem>>, vector<128x128xbf16>
    %cst_10 = arith.constant dense<0.000000e+00> : vector<128x128xf32>
    %21 = tpu.matmul %19, %20, %cst_10 {dimension_numbers = #tpu.dot_dimension_numbers<[1], [0], [0], [1], [0, 0, 1, 1], [], []>} : vector<128x128xbf16>, vector<128x128xbf16>, vector<128x128xf32> -> vector<128x128xf32>
    %22 = vector.extract_strided_slice %3 {offsets = [1, 0], sizes = [1, 128], strides = [1, 1]} : vector<16x128xf32> to vector<1x128xf32>
    %23 = vector.broadcast %22 : vector<1x128xf32> to vector<128x128xf32>
    %24 = arith.addf %21, %23 : vector<128x128xf32>
    %cst_11 = arith.constant 0.000000e+00 : f32
    %25 = vector.broadcast %cst_11 : f32 to vector<128x128xf32>
    %26 = arith.cmpf ogt, %24, %25 : vector<128x128xf32>
    %cst_12 = arith.constant 0.00999999977 : f32
    %27 = vector.broadcast %cst_12 : f32 to vector<128x128xf32>
    %28 = arith.mulf %27, %24 : vector<128x128xf32>
    %29 = arith.select %26, %24, %28 : vector<128x128xi1>, vector<128x128xf32>
    %30 = arith.truncf %29 : vector<128x128xf32> to vector<128x128xbf16>
    %c240 = arith.constant 240 : index
    %c0_13 = arith.constant 0 : index
    %31 = vector.load %arg3[%c240, %c0_13] : memref<896x128xbf16, #tpu.memory_space<vmem>>, vector<128x128xbf16>
    %cst_14 = arith.constant dense<0.000000e+00> : vector<128x128xf32>
    %32 = tpu.matmul %30, %31, %cst_14 {dimension_numbers = #tpu.dot_dimension_numbers<[1], [0], [0], [1], [0, 0, 1, 1], [], []>} : vector<128x128xbf16>, vector<128x128xbf16>, vector<128x128xf32> -> vector<128x128xf32>
    %33 = vector.extract_strided_slice %3 {offsets = [2, 0], sizes = [1, 128], strides = [1, 1]} : vector<16x128xf32> to vector<1x128xf32>
    %34 = vector.broadcast %33 : vector<1x128xf32> to vector<128x128xf32>
    %35 = arith.addf %32, %34 : vector<128x128xf32>
    %cst_15 = arith.constant 0.000000e+00 : f32
    %36 = vector.broadcast %cst_15 : f32 to vector<128x128xf32>
    %37 = arith.cmpf ogt, %35, %36 : vector<128x128xf32>
    %cst_16 = arith.constant 0.00999999977 : f32
    %38 = vector.broadcast %cst_16 : f32 to vector<128x128xf32>
    %39 = arith.mulf %38, %35 : vector<128x128xf32>
    %40 = arith.select %37, %35, %39 : vector<128x128xi1>, vector<128x128xf32>
    %41 = vector.extract_strided_slice %3 {offsets = [5, 0], sizes = [1, 128], strides = [1, 1]} : vector<16x128xf32> to vector<1x128xf32>
    %42 = vector.broadcast %41 : vector<1x128xf32> to vector<128x128xf32>
    %43 = arith.mulf %18, %42 : vector<128x128xf32>
    %44 = arith.addf %40, %43 : vector<128x128xf32>
    %45 = arith.truncf %44 : vector<128x128xf32> to vector<128x128xbf16>
    %c368 = arith.constant 368 : index
    %c0_17 = arith.constant 0 : index
    %46 = vector.load %arg3[%c368, %c0_17] : memref<896x128xbf16, #tpu.memory_space<vmem>>, vector<128x128xbf16>
    %cst_18 = arith.constant dense<0.000000e+00> : vector<128x128xf32>
    %47 = tpu.matmul %45, %46, %cst_18 {dimension_numbers = #tpu.dot_dimension_numbers<[1], [0], [0], [1], [0, 0, 1, 1], [], []>} : vector<128x128xbf16>, vector<128x128xbf16>, vector<128x128xf32> -> vector<128x128xf32>
    %48 = vector.extract_strided_slice %3 {offsets = [3, 0], sizes = [1, 128], strides = [1, 1]} : vector<16x128xf32> to vector<1x128xf32>
    %49 = vector.broadcast %48 : vector<1x128xf32> to vector<128x128xf32>
    %50 = arith.addf %47, %49 : vector<128x128xf32>
    %51 = vector.extract_strided_slice %50 {offsets = [0, 16], sizes = [128, 16], strides = [1, 1]} : vector<128x128xf32> to vector<128x16xf32>
    %52 = vector.broadcast %2 : vector<128x1xf32> to vector<128x16xf32>
    %53 = arith.mulf %52, %51 : vector<128x16xf32>
    %54 = vector.extract_strided_slice %50 {offsets = [0, 0], sizes = [128, 16], strides = [1, 1]} : vector<128x128xf32> to vector<128x16xf32>
    %55 = arith.addf %53, %54 : vector<128x16xf32>
    %56 = arith.truncf %55 : vector<128x16xf32> to vector<128x16xbf16>
    %c496 = arith.constant 496 : index
    %c0_19 = arith.constant 0 : index
    %57 = vector.load %arg3[%c496, %c0_19] : memref<896x128xbf16, #tpu.memory_space<vmem>>, vector<16x128xbf16>
    %cst_20 = arith.constant dense<0.000000e+00> : vector<128x128xf32>
    %58 = tpu.matmul %56, %57, %cst_20 {dimension_numbers = #tpu.dot_dimension_numbers<[1], [0], [0], [1], [0, 0, 1, 1], [], []>} : vector<128x16xbf16>, vector<16x128xbf16>, vector<128x128xf32> -> vector<128x128xf32>
    %59 = vector.extract_strided_slice %3 {offsets = [6, 0], sizes = [1, 128], strides = [1, 1]} : vector<16x128xf32> to vector<1x128xf32>
    %60 = vector.broadcast %59 : vector<1x128xf32> to vector<128x128xf32>
    %61 = arith.addf %58, %60 : vector<128x128xf32>
    %cst_21 = arith.constant 0.000000e+00 : f32
    %62 = vector.broadcast %cst_21 : f32 to vector<128x128xf32>
    %63 = arith.cmpf ogt, %61, %62 : vector<128x128xf32>
    %cst_22 = arith.constant 0.00999999977 : f32
    %64 = vector.broadcast %cst_22 : f32 to vector<128x128xf32>
    %65 = arith.mulf %64, %61 : vector<128x128xf32>
    %66 = arith.select %63, %61, %65 : vector<128x128xi1>, vector<128x128xf32>
    %67 = arith.truncf %66 : vector<128x128xf32> to vector<128x128xbf16>
    %c512 = arith.constant 512 : index
    %c0_23 = arith.constant 0 : index
    %68 = vector.load %arg3[%c512, %c0_23] : memref<896x128xbf16, #tpu.memory_space<vmem>>, vector<128x128xbf16>
    %cst_24 = arith.constant dense<0.000000e+00> : vector<128x128xf32>
    %69 = tpu.matmul %67, %68, %cst_24 {dimension_numbers = #tpu.dot_dimension_numbers<[1], [0], [0], [1], [0, 0, 1, 1], [], []>} : vector<128x128xbf16>, vector<128x128xbf16>, vector<128x128xf32> -> vector<128x128xf32>
    %70 = vector.extract_strided_slice %3 {offsets = [7, 0], sizes = [1, 128], strides = [1, 1]} : vector<16x128xf32> to vector<1x128xf32>
    %71 = vector.broadcast %70 : vector<1x128xf32> to vector<128x128xf32>
    %72 = arith.addf %69, %71 : vector<128x128xf32>
    %cst_25 = arith.constant 0.000000e+00 : f32
    %73 = vector.broadcast %cst_25 : f32 to vector<128x128xf32>
    %74 = arith.cmpf ogt, %72, %73 : vector<128x128xf32>
    %cst_26 = arith.constant 0.00999999977 : f32
    %75 = vector.broadcast %cst_26 : f32 to vector<128x128xf32>
    %76 = arith.mulf %75, %72 : vector<128x128xf32>
    %77 = arith.select %74, %72, %76 : vector<128x128xi1>, vector<128x128xf32>
    %78 = arith.truncf %77 : vector<128x128xf32> to vector<128x128xbf16>
    %c640 = arith.constant 640 : index
    %c0_27 = arith.constant 0 : index
    %79 = vector.load %arg3[%c640, %c0_27] : memref<896x128xbf16, #tpu.memory_space<vmem>>, vector<128x128xbf16>
    %cst_28 = arith.constant dense<0.000000e+00> : vector<128x128xf32>
    %80 = tpu.matmul %78, %79, %cst_28 {dimension_numbers = #tpu.dot_dimension_numbers<[1], [0], [0], [1], [0, 0, 1, 1], [], []>} : vector<128x128xbf16>, vector<128x128xbf16>, vector<128x128xf32> -> vector<128x128xf32>
    %81 = vector.extract_strided_slice %3 {offsets = [8, 0], sizes = [1, 128], strides = [1, 1]} : vector<16x128xf32> to vector<1x128xf32>
    %82 = vector.broadcast %81 : vector<1x128xf32> to vector<128x128xf32>
    %83 = arith.addf %80, %82 : vector<128x128xf32>
    %cst_29 = arith.constant 0.000000e+00 : f32
    %84 = vector.broadcast %cst_29 : f32 to vector<128x128xf32>
    %85 = arith.cmpf ogt, %83, %84 : vector<128x128xf32>
    %cst_30 = arith.constant 0.00999999977 : f32
    %86 = vector.broadcast %cst_30 : f32 to vector<128x128xf32>
    %87 = arith.mulf %86, %83 : vector<128x128xf32>
    %88 = arith.select %85, %83, %87 : vector<128x128xi1>, vector<128x128xf32>
    %89 = arith.truncf %88 : vector<128x128xf32> to vector<128x128xbf16>
    %c768 = arith.constant 768 : index
    %c0_31 = arith.constant 0 : index
    %90 = vector.load %arg3[%c768, %c0_31] : memref<896x128xbf16, #tpu.memory_space<vmem>>, vector<128x128xbf16>
    %cst_32 = arith.constant dense<0.000000e+00> : vector<128x128xf32>
    %91 = tpu.matmul %89, %90, %cst_32 {dimension_numbers = #tpu.dot_dimension_numbers<[1], [0], [0], [1], [0, 0, 1, 1], [], []>} : vector<128x128xbf16>, vector<128x128xbf16>, vector<128x128xf32> -> vector<128x128xf32>
    %92 = vector.extract_strided_slice %3 {offsets = [9, 0], sizes = [1, 128], strides = [1, 1]} : vector<16x128xf32> to vector<1x128xf32>
    %93 = vector.broadcast %92 : vector<1x128xf32> to vector<128x128xf32>
    %94 = arith.addf %91, %93 : vector<128x128xf32>
    %95 = vector.extract_strided_slice %50 {offsets = [0, 32], sizes = [128, 10], strides = [1, 1]} : vector<128x128xf32> to vector<128x10xf32>
    %96 = vector.extract_strided_slice %94 {offsets = [0, 0], sizes = [128, 10], strides = [1, 1]} : vector<128x128xf32> to vector<128x10xf32>
    %97 = arith.mulf %95, %96 : vector<128x10xf32>
    %98 = vector.extract_strided_slice %50 {offsets = [0, 48], sizes = [128, 1], strides = [1, 1]} : vector<128x128xf32> to vector<128x1xf32>
    %cst_33 = arith.constant 0.316227764 : f32
    %99 = vector.broadcast %cst_33 : f32 to vector<128x1xf32>
    %100 = arith.mulf %98, %99 : vector<128x1xf32>
    %101 = vector.broadcast %100 : vector<128x1xf32> to vector<128x10xf32>
    %102 = arith.addf %97, %101 : vector<128x10xf32>
    %cst_34 = arith.constant 0.316227764 : f32
    %103 = vector.broadcast %cst_34 : f32 to vector<1x10xf32>
    %cst_35 = arith.constant dense<0.000000e+00> : vector<1x128xf32>
    %104 = tpu.matmul %103, %102, %cst_35 {dimension_numbers = #tpu.dot_dimension_numbers<[1], [1], [0], [0], [0, 0, 1, 0], [], []>} : vector<1x10xf32>, vector<128x10xf32>, vector<1x128xf32> -> vector<1x128xf32>
    %c0_36 = arith.constant 0 : index
    %c0_37 = arith.constant 0 : index
    %105 = vector.load %arg5[%c0_36, %c0_37] : memref<1x128xf32, #tpu.memory_space<vmem>>, vector<1x128xf32>
    tpu.vector_store %arg5[%c0_36, %c0_37], %104 {strides = array<i32>} : memref<1x128xf32, #tpu.memory_space<vmem>>, vector<1x128xf32>,
    return
  }
  func.func @transform_0(%arg0: i32) -> (i32, i32) {
    %c0_i32 = arith.constant 0 : i32
    %c0_i32_0 = arith.constant 0 : i32
    return %arg0, %c0_i32 : i32, i32
  }
  func.func @transform_1(%arg0: i32) -> (i32, i32) {
    %c0_i32 = arith.constant 0 : i32
    %c0_i32_0 = arith.constant 0 : i32
    return %arg0, %c0_i32 : i32, i32
  }
  func.func @transform_2(%arg0: i32) -> (i32, i32) {
    %c0_i32 = arith.constant 0 : i32
    %c0_i32_0 = arith.constant 0 : i32
    %c0_i32_1 = arith.constant 0 : i32
    return %c0_i32, %c0_i32_0 : i32, i32
  }
  func.func @transform_3(%arg0: i32) -> (i32, i32) {
    %c0_i32 = arith.constant 0 : i32
    %c0_i32_0 = arith.constant 0 : i32
    %c0_i32_1 = arith.constant 0 : i32
    return %c0_i32, %c0_i32_0 : i32, i32
  }
  func.func @transform_4(%arg0: i32) -> (i32, i32) {
    %c0_i32 = arith.constant 0 : i32
    %c0_i32_0 = arith.constant 0 : i32
    return %c0_i32, %arg0 : i32, i32
  }
}

</mosaic_0001>

<bundles_post_ra>
// kernel: tpu_custom_call.1
= control target key start
LH: loop header
LB: loop body
LE: loop exit
PB: predicated region body
PF: predicated region fallthrough
CT: control target
= control target key end

     0   :  { %9 = vsyncpa [#allocation3], 0  ;;  %s4332_s0 = inlined_call_operand.vmem [shape: f32[200,100], index: 0, kind: input, shape index: {}]   ;;  %s4333_s1 = inlined_call_operand.vmem [shape: f32[200,1], index: 1, kind: input, shape index: {}]   ;;  %s4334_s2 = inlined_call_operand.hbm [shape: bf16[896,128], index: 2, kind: input, shape index: {}]   ;;  %s4335_s3 = inlined_call_operand.hbm [shape: f32[16,128], index: 3, kind: input, shape index: {}]   ;;  %s4336_s4 = inlined_call_operand.hbm [shape: f32[1,200], index: 4, kind: output, shape index: {}]  }
   0x1   :  { %10 = vsyncpa [#allocation6], 0 }
   0x2   :  { %11 = vsyncpa [#allocation4], 0 }
   0x3   :  { %13 = vsyncpa [#allocation4 + $0x1], 0  ;;  %s3597_s15 = smov 0   ;;  %s3599_s16 = smov 0  }
   0x4   :  { %s3601_s17 = smov 0   ;;  %s3603_s18 = smov 0  }
   0x5 LB: > { %s3618_s19 = sadd.s32 4294967295, %s3553_s18   ;;  %s2703_s20 = sadd.s32 4294967294, %s3553_s18   ;;  %s3553_s18 = sphi %s3603_s18, %s4356_s18   ;;  %s3549_s17 = sphi %s3601_s17, %s4355_s17   ;;  %s3545_s16 = sphi %s3599_s16, %s4354_s16   ;;  %s3541_s15 = sphi %s3597_s15, %s4353_s15  }
   0x6   : > { %s3622_s21 = sadd.s32 1, %s3553_s18   ;;  %s120_s22 = sadd.s32 1, %s3549_s17 }
   0x7   : > { %s117_s23 = ssub.s32 %s3553_s18, %s3622_s21  ;;  %p130_p0 = scmp.ne.s32.totalorder %s3549_s17, %s3545_s16 }
   0x8   : > { %p118_p1 = scmp.eq.s32.totalorder %s117_s23, 0  ;;  %p131_p2 = scmp.eq.s32.totalorder %s3618_s19, 1 }
   0x9   : > { %p136_p3 = scmp.ne.s32.totalorder %s3545_s16, %s3541_s15  ;;  %p137_p4 = scmp.eq.s32.totalorder %s2703_s20, 1 }
   0xa   : > { %s3633_s24 = scalar_select %p118_p1, %s3549_s17, %s120_s22  }
   0xb   : > { %p3635_p5 = por %p131_p2, %p130_p0  ;;  %p3639_p6 = por %p137_p4, %p136_p3 }
   0xc   : > { %p2704_p7 = scmp.ge.s32.totalorder %s3553_s18, 1  ;;  %p144_p8 = scmp.lt.s32.totalorder %s3553_s18, 3 }
   0xd   : > { %s4340_s25 = scalar_select %p3635_p5, 1, 0 }
   0xe   : > { %s4341_s26 = scalar_select %p3639_p6, 1, 0 }
   0xf   : > { %p4337_p9 = scmp.eq.s32.totalorder %s3618_s19, 0  ;;  %p3646_p10 = pnand %p2704_p7, %p144_p8 }
  0x10   : > { %s3555_s28 = smov [#allocation2]   ;;  %s3556_s5 = smov [#allocation5]  }
  0x11   : > { %s4342_s27 = scalar_select %p3646_p10, 1, 0 }
  0x12   : > { %s156_s29 = sshll.u32 %s3555_s28, 4  ;;  %p3262_p11 = pneg %p3646_p10  ;;  %s157_s29 = int_to_ptr.vmem [resolvable:$true] %s156_s29 }
  0x13   : > { %s169_s6 = sshll.u32 %s3556_s5, 4  ;;  %s3427_s9 = scalar_lea.hbm %s4334_s2, 7168  ;;  %s3658_s6 = int_to_ptr.vmem [resolvable:$true] %s169_s6 }
  0x14   : > { %p3654_p12 = pnand %p4337_p9, %p3262_p11  ;;  %p3428_p13 = scmp.ne.s32.totalorder %s4334_s2, %s3427_s9 }
  0x15   : > { %p3434_p3 = scmp.lt.u32.totalorder %s3427_s9, %s4334_s2 }
  0x16   : > { %p3429_p0 = pneg %p3654_p12 }
  0x18   : > { %p3430_p1 = pnand %p3429_p0, %p3428_p13 }
  0x1a   : > { %p3431_p2 = pneg %p3430_p1 }
  0x1c   : > { %p3436_p4 = pnand %p3434_p3, %p3431_p2 }
  0x1e   : > { %3439 = shalt.err (!%p3436_p4)
}
  0x1f   : > { %s3440_s14 = scalar_lea.vmem %s157_s29, 7168  ;;  %p3448_p9 = scmp.lt.s32.totalorder %s157_s29, %s157_s29 }
  0x20   : > { %p3441_p7 = scmp.ne.s32.totalorder %s157_s29, %s3440_s14  ;;  %p3449_p6 = scmp.lt.s32.totalorder %s3440_s14, %s3440_s14 }
  0x22   : > { %p3443_p8 = pnand %p3441_p7, %p3429_p0  ;;  %p3450_p5 = por %p3449_p6, %p3448_p9 }
  0x24   : > { %p3444_p11 = pneg %p3443_p8 }
  0x26   : > { %p3451_p10 = pnand %p3450_p5, %p3444_p11 }
  0x28   : > { %3454 = shalt.err (!%p3451_p10)
}
  0x29   : > { %s3557_s20 = smov 64   ;;  %s3558_s22 = smov 4  }
  0x2a   : > { %3265 = dma.hbm_to_vmem [thread:$0]  (!%p3654_p12), %s4334_s2, 7168, %s157_s29, [#allocation3], %s3557_s20, %s3557_s20, %s3558_s22  }
  0x2b   : > { %s3455_s8 = scalar_lea.hbm %s4335_s3, 256 }
  0x2c   : > { %p3456_p13 = scmp.ne.s32.totalorder %s4335_s3, %s3455_s8  ;;  %p3462_p9 = scmp.lt.u32.totalorder %s3455_s8, %s4335_s3 }
  0x2e   : > { %p3458_p5 = pnand %p3456_p13, %p3429_p0 }
  0x30   : > { %p3459_p6 = pneg %p3458_p5 }
  0x32   : > { %p3464_p10 = pnand %p3462_p9, %p3459_p6 }
  0x34   : > { %3467 = shalt.err (!%p3464_p10)
}
  0x35   : > { %s3468_s29 = scalar_lea.vmem %s3658_s6, 256  ;;  %p3476_p4 = scmp.lt.s32.totalorder %s3658_s6, %s3658_s6 }
  0x36   : > { %p3469_p1 = scmp.ne.s32.totalorder %s3658_s6, %s3468_s29  ;;  %p3477_p7 = scmp.lt.s32.totalorder %s3468_s29, %s3468_s29 }
  0x38   : > { %p3471_p2 = pnand %p3469_p1, %p3429_p0  ;;  %p3478_p8 = por %p3477_p7, %p3476_p4 }
  0x3a   : > { %p3472_p3 = pneg %p3471_p2 }
  0x3c   : > { %p3479_p11 = pnand %p3478_p8, %p3472_p3 }
  0x3e   : > { %3482 = shalt.err (!%p3479_p11)
}
  0x3f   : > { %s3559_s13 = smov 128   ;;  %s3560_s14 = smov 8  }
  0x40   : > { %3268 = dma.hbm_to_vmem [thread:$0]  (!%p3654_p12), %s4335_s3, 256, %s3658_s6, [#allocation6], %s3559_s13, %s3559_s13, %s3560_s14  }
  0x41   : > { %p4344_p13 = scmp.ne.s32.totalorder %s4342_s27, 0 }
  0x42   : > { %p4345_p0 = scmp.eq.s32.totalorder (!%p4344_p13), %s3618_s19, 0 }
  0x43   : > { %219 = sbr.rel (%p4344_p13) target bundleno = 2664 (0xa68), region = 36 }
  0x4a   : > { %3528 = dma.done.wait (%p4345_p0), [#allocation3], 7168   ;;  %p4346_p5 = pmov %p4345_p0 }
  0x4b   : > { %p4347_p6 = pmov %p4345_p0 }
  0x4c   : > { %3530 = vsyncadd (%p4346_p5), [#allocation3], 4294960128 }
  0x4d   : > { %3532 = dma.done.wait (%p4347_p6), [#allocation6], 256   ;;  %p4348_p9 = pmov %p4345_p0 }
  0x4e   : > { %s3718_s30 = sshll.u32 %s3618_s19, 4  ;;  %v3561_v0 = vmov 0   ;;  %v3370_v1 = vld [vmem:[#allocation2] sm:$0xff]   ;;  %v3371_v2 = vld [vmem:[#allocation2 + $0x8] sm:$0xff]   ;;  %v3372_v3 = vld [vmem:[#allocation2 + $0x10] sm:$0xff]   ;;  %vm484_vm0 = vcmask 818176  }
  0x4f   : > { %3534 = vsyncadd (%p4348_p9), [#allocation6], 4294967040  ;;  %p266_p12 = scmp.lt.s32.totalorder %s3718_s30, 24  ;;  %3326 = vset.pattern.permute.xlu0 %v3561_v0  ;;  %3327 = vset.pattern.permute.xlu1 %v3561_v0  ;;  %v3373_v6 = vld [vmem:[#allocation2 + $0x18] sm:$0xff]   ;;  %v3374_v8 = vld [vmem:[#allocation2 + $0x20] sm:$0xff]   ;;  %vm509_vm1 = vcmask 1041408   ;;  %v425_v0 = vlaneseq }
  0x50   : > { %2944 = vmatprep.subr.bf16.mxu1 %v3370_v1  ;;  %v3375_v13 = vld [vmem:[#allocation2 + $0x28] sm:$0xff]   ;;  %v3376_v14 = vld [vmem:[#allocation2 + $0x30] ss:$0 sps:$4 sm:$0x33]   ;;  %v3377_v24 = vld [vmem:[#allocation2 + $0x38] sm:$0xff]   ;;  %s3562_s9 = smov 16  }
  0x51   : > { %s267_s27 = scalar_select %p266_p12, %s3718_s30, 24  ;;  %2945 = vmatpush3.bf16.msra.mxu1 %v3370_v1  ;;  %v511_v18 = vsel %vm509_vm1, %v3376_v14, 0  ;;  %v3378_v33 = vld [vmem:[#allocation2 + $0x40] sm:$0xff]   ;;  %v3379_v38 = vld [vmem:[#allocation2 + $0x48] sm:$0xff]   ;;  %v3380_v45 = vld [vmem:[#allocation2 + $0x50] sm:$0xff]  }
  0x52   : > { %2946 = vmatprep.subr.bf16.mxu1 %v3371_v2  ;;  %v3381_v48 = vld [vmem:[#allocation2 + $0x58] sm:$0xff]   ;;  %v3382_v54 = vld [vmem:[#allocation2 + $0x60] sm:$0xff]   ;;  %v3383_v55 = vld [vmem:[#allocation2 + $0x68] sm:$0xff]   ;;  %s3564_s10 = smov 112   ;;  %s3565_s11 = smov 32  }
  0x53   : > { %s2712_s6 = sshll.u32 %s267_s27, 3  ;;  %v3384_v56 = vld [vmem:[#allocation2 + $0x70] sm:$0xff]   ;;  %v3385_v57 = vld [vmem:[#allocation2 + $0x78] sm:$0xff]   ;;  %v3386_v58 = vld [vmem:[#allocation2 + $0x80] sm:$0xff]   ;;  %s3567_s12 = smov 96  }
  0x54   : > { %s3725_s5 = scalar_lea.vmem %s4332_s0, %s2712_s6  ;;  %s3732_s8 = scalar_lea.vmem %s4333_s1, %s2712_s6  ;;  %3006 = vmatprep.subr.bf16.mxu0 %v3385_v57  ;;  %v3387_v59 = vld [vmem:[#allocation2 + $0x88] sm:$0xff]   ;;  %v3388_v60 = vld [vmem:[#allocation2 + $0x90] sm:$0xff]   ;;  %v3389_v61 = vld [vmem:[#allocation2 + $0x98] sm:$0xff]  }
  0x55   : > { %v290_v4 = vld [vmem:[%s3725_s5] sm:$0xff]  ;;  %2947 = vmatpush3.bf16.msra.mxu1 %v3371_v2  ;;  %v291_v5 = vld [vmem:[%s3725_s5 + $0x8] sm:$0xff]  ;;  %v316_v10 = vld [vmem:[%s3732_s8 + $0x10] sm:$0xff]  ;;  %3007 = vmatpush3.bf16.msra.mxu0 %v3385_v57  ;;  %v3780_v2 = vshrl.u32 %v425_v0, 7  ;;  %s259_s29 = sand.u32 1, %s3545_s16   ;;  %s4292_s27 = scalar_lea.hbm %s4336_s4, %s3718_s30 }
  0x56   : > { %2948 = vmatprep.subr.bf16.mxu1 %v3372_v3  ;;  %v306_v7 = vpack.c.bf16 %v291_v5, %v290_v4  ;;  %v314_v9 = vld [vmem:[%s3732_s8] sm:$0xff]  ;;  %357 = vperm.xlu1 %3327, %v316_v10   ;;  %v315_v11 = vld [vmem:[%s3732_s8 + $0x8] sm:$0xff]  ;;  %v317_v12 = vld [vmem:[%s3732_s8 + $0x18] sm:$0xff]  ;;  %s260_s13 = scalar_lea.vmem [#allocation7], %s259_s29  ;;  %s2602_s6 = scalar_lea.sflag [#allocation4], %s259_s29 }
  0x57   : > { %347 = vperm.xlu0 %3326, %v314_v9   ;;  %v318_v15 = vld [vmem:[%s3732_s8 + $0x20] sm:$0xff]  ;;  %v319_v16 = vld [vmem:[%s3732_s8 + $0x28] sm:$0xff]  ;;  %v320_v17 = vld [vmem:[%s3732_s8 + $0x30] sm:$0xff]  ;;  %3008 = vmatprep.subr.bf16.mxu0 %v3386_v58  ;;  %v427_v4 = vsub.s32 4, %v3780_v2  ;;  %v612_v9 = vsub.s32 0, %v3780_v2  ;;  %s2614_s14 = sshll.u32 %s260_s13, 4  ;;  %s4286_s14 = int_to_ptr.vmem [resolvable:$true] %s2614_s14 }
  0x58   : > { %2958 = vmatprep.mubr.msk.bf16.mxu1 %vm484_vm0, %v306_v7  ;;  %v292_v19 = vld [vmem:[%s3725_s5 + $0x10] sm:$0xff]  ;;  %v293_v20 = vld [vmem:[%s3725_s5 + $0x18] sm:$0xff]  ;;  %v294_v22 = vld [vmem:[%s3725_s5 + $0x20] sm:$0xff]  ;;  %s3483_s23 = scalar_lea.vmem %s4286_s14, 16  ;;  %p4351_p1 = scmp.ne.s32.totalorder %s4340_s25, 0 }
  0x59   : > { %2949 = vmatpush3.bf16.msra.mxu1 %v3372_v3  ;;  %v321_v21 = vld [vmem:[%s3732_s8 + $0x38] sm:$0xff]  ;;  %v295_v23 = vld [vmem:[%s3725_s5 + $0x28] sm:$0xff]  ;;  %v322_v25 = vld [vmem:[%s3732_s8 + $0x40] sm:$0xff]  ;;  %v307_v27 = vpack.c.bf16 %v293_v20, %v292_v19  ;;  %3009 = vmatpush3.bf16.msra.mxu0 %v3386_v58  ;;  %p3484_p10 = scmp.ne.s32.totalorder %s4286_s14, %s3483_s23  ;;  %s3571_s28 = smov [#allocation7]  }
  0x5a   : > { %2950 = vmatprep.subr.bf16.mxu1 %v3373_v6  ;;  %362 = vperm.xlu1 %3327, %v317_v12   ;;  %v323_v26 = vld [vmem:[%s3732_s8 + $0x48] sm:$0xff]  ;;  %v308_v28 = vpack.c.bf16 %v295_v23, %v294_v22  ;;  %v324_v29 = vld [vmem:[%s3732_s8 + $0x50] sm:$0xff]  ;;  %v325_v30 = vld [vmem:[%s3732_s8 + $0x58] sm:$0xff] }
  0x5b   : > { %352 = vperm.xlu0 %3326, %v315_v11   ;;  %v296_v31 = vld [vmem:[%s3725_s5 + $0x30] sm:$0xff]  ;;  %v297_v32 = vld [vmem:[%s3725_s5 + $0x38] sm:$0xff]  ;;  %v298_v34 = vld [vmem:[%s3725_s5 + $0x40] sm:$0xff]  ;;  %3010 = vmatprep.subr.bf16.mxu0 %v3387_v59  ;;  %p3485_p2 = pnand %p3484_p10, %p4351_p1 }
  0x5c   : > { %v299_v35 = vld [vmem:[%s3725_s5 + $0x48] sm:$0xff]  ;;  %v326_v36 = vld [vmem:[%s3732_s8 + $0x60] sm:$0xff]  ;;  %v309_v39 = vpack.c.bf16 %v297_v32, %v296_v31  ;;  %v328_v41 = vld [vmem:[%s3732_s8 + $0x70] sm:$0xff] }
  0x5d   : > { %2951 = vmatpush3.bf16.msra.mxu1 %v3373_v6  ;;  %v327_v37 = vld [vmem:[%s3732_s8 + $0x68] sm:$0xff]  ;;  %v310_v40 = vpack.c.bf16 %v299_v35, %v298_v34  ;;  %v329_v42 = vld [vmem:[%s3732_s8 + $0x78] sm:$0xff]  ;;  %v300_v43 = vld [vmem:[%s3725_s5 + $0x50] sm:$0xff]  ;;  %3011 = vmatpush3.bf16.msra.mxu0 %v3387_v59  ;;  %p3486_p3 = pneg %p3485_p2 }
  0x5e   : > { %2952 = vmatprep.subr.bf16.mxu1 %v3374_v8  ;;  %372 = vperm.xlu1 %3327, %v319_v16   ;;  %v301_v44 = vld [vmem:[%s3725_s5 + $0x58] sm:$0xff]  ;;  %v302_v46 = vld [vmem:[%s3725_s5 + $0x60] sm:$0xff]  ;;  %v303_v47 = vld [vmem:[%s3725_s5 + $0x68] sm:$0xff] }
  0x5f   : > { %367 = vperm.xlu0 %3326, %v318_v15   ;;  %v311_v49 = vpack.c.bf16 %v301_v44, %v300_v43  ;;  %v312_v50 = vpack.c.bf16 %v303_v47, %v302_v46  ;;  %v304_v51 = vld [vmem:[%s3725_s5 + $0x70] sm:$0xff]  ;;  %v305_v52 = vld [vmem:[%s3725_s5 + $0x78] sm:$0xff]  ;;  %3012 = vmatprep.subr.bf16.mxu0 %v3388_v60  ;;  %v3785_v5 = vld [vmem:[#allocation5] sm:$0xff]  ;;  %s3487_s5 = sshll.u32 %s3571_s28, 4  ;;  %s3488_s5 = int_to_ptr.vmem [resolvable:$false] %s3487_s5 }
  0x60   : > { %v313_v53 = vpack.c.bf16 %v305_v52, %v304_v51  ;;  %s3489_s19 = scalar_lea.vmem %s3488_s5, 32  ;;  %p3490_p4 = scmp.lt.s32.totalorder %s4286_s14, %s3488_s5 }
  0x61   : > { %2953 = vmatpush3.bf16.msra.mxu1 %v3374_v8  ;;  %3013 = vmatpush3.bf16.msra.mxu0 %v3388_v60  ;;  %v3792_v8 = vrot.slane %v3785_v5, %v427_v4  ;;  %p3491_p7 = scmp.lt.s32.totalorder %s3489_s19, %s3483_s23 }
  0x62   : > { %2954 = vmatprep.subr.bf16.mxu1 %v3375_v13  ;;  %382 = vperm.xlu1 %3327, %v321_v21  }
  0x63   : > { %377 = vperm.xlu0 %3326, %v320_v17   ;;  %3014 = vmatprep.subr.bf16.mxu0 %v3389_v61  ;;  %p3492_p8 = por %p3491_p7, %p3490_p4 }
  0x65   : > { %2955 = vmatpush3.bf16.msra.mxu1 %v3375_v13  ;;  %3015 = vmatpush3.bf16.msra.mxu0 %v3389_v61  ;;  %v3804_v13 = vrot.slane %v3785_v5, %v612_v9  ;;  %p3493_p11 = pnand %p3492_p8, %p3486_p3 }
  0x66   : > { %3251 = vmatprep.subr.msk.bf16.mxu1 %vm509_vm1, %v3376_v14  ;;  %392 = vperm.xlu1 %3327, %v323_v26  }
  0x67   : > { %387 = vperm.xlu0 %3326, %v322_v25  }
  0x69   : > { %2957 = vmatpush3.bf16.msra.mxu1 %v511_v18 }
  0x6a   : > { %2974 = vmatprep.subr.bf16.mxu1 %v3377_v24  ;;  %402 = vperm.xlu1 %3327, %v325_v30  }
  0x6b   : > { %397 = vperm.xlu0 %3326, %v324_v29  }
  0x6c   : > { %2959 = vmatmul.mubr.msk.bf16.vlgmr.msra.gmra.mrb[0].mxu1 %vm484_vm0, %v307_v27 }
  0x6d   : > { %2962 = vmatprep.mubr.msk.bf16.mxu1 %vm484_vm0, %v308_v28  ;;  %2975 = vmatpush3.bf16.msra.mxu1 %v3377_v24 }
  0x6e   : > { %2976 = vmatprep.subr.bf16.mxu1 %v3378_v33  ;;  %412 = vperm.xlu1 %3327, %v327_v37  }
  0x6f   : > { %407 = vperm.xlu0 %3326, %v326_v36  }
  0x71   : > { %2977 = vmatpush3.bf16.msra.mxu1 %v3378_v33 }
  0x72   : > { %2978 = vmatprep.subr.bf16.mxu1 %v3379_v38  ;;  %422 = vperm.xlu1 %3327, %v329_v42  }
  0x73   : > { %417 = vperm.xlu0 %3326, %v328_v41  }
  0x74   : > { %2963 = vmatmul.mubr.msk.bf16.gmra.mrb[4].mxu1 %vm484_vm0, %v309_v39 }
  0x75   : > { %2966 = vmatprep.mubr.msk.bf16.mxu1 %vm484_vm0, %v310_v40  ;;  %2979 = vmatpush3.bf16.msra.mxu1 %v3379_v38 }
  0x76   : > { %2980 = vmatprep.subr.bf16.mxu1 %v3380_v45 }
  0x79   : > { %2981 = vmatpush3.bf16.msra.mxu1 %v3380_v45 }
  0x7a   : > { %2982 = vmatprep.subr.bf16.mxu1 %v3381_v48 }
  0x7c   : > { %2967 = vmatmul.mubr.msk.bf16.gmra.mrb[8].mxu1 %vm484_vm0, %v311_v49 }
  0x7d   : > { %2970 = vmatprep.mubr.msk.bf16.mxu1 %vm484_vm0, %v312_v50  ;;  %2983 = vmatpush3.bf16.msra.mxu1 %v3381_v48 }
  0x7e   : > { %2984 = vmatprep.subr.bf16.mxu1 %v3382_v54 }
  0x81   : > { %2985 = vmatpush3.bf16.msra.mxu1 %v3382_v54 }
  0x82   : > { %2986 = vmatprep.subr.bf16.mxu1 %v3383_v55 }
  0x84   : > { %2971 = vmatmul.mubr.msk.bf16.gmra.mrb[12].mxu1 %vm484_vm0, %v313_v53 }
  0x85   : > { %2987 = vmatpush3.bf16.msra.mxu1 %v3383_v55 }
  0x86   : > { %2988 = vmatprep.subr.bf16.mxu1 %v3384_v56 }
  0x89   : > { %2989 = vmatpush3.bf16.msra.mxu1 %v3384_v56 }
  0xd5   : > { %v3776_v63 = vpop.permute.xlu1 %357 }
  0xd6   : > { %v3774_v62 = vpop.permute.xlu0 %347  ;;  %v431_v11 = vmul.f32 %v3792_v8, %v3776_v63 }
  0xd7   : > { %v429_v14 = vmul.f32 %v3792_v8, %v3774_v62 }
  0xd9   : > { %v3782_v3 = vpop.permute.xlu1 %362 }
  0xda   : > { %v3778_v1 = vpop.permute.xlu0 %352  ;;  %v432_v16 = vmul.f32 %v3792_v8, %v3782_v3 }
  0xdb   : > { %v430_v19 = vmul.f32 %v3792_v8, %v3778_v1 }
  0xdd   : > { %v3789_v7 = vpop.permute.xlu1 %372 }
  0xde   : > { %v3787_v6 = vpop.permute.xlu0 %367  ;;  %v434_v36 = vmul.f32 %v3792_v8, %v3789_v7 }
  0xdf   : > { %v433_v35 = vmul.f32 %v3792_v8, %v3787_v6 }
  0xe1   : > { %v3799_v12 = vpop.permute.xlu1 %382 }
  0xe2   : > { %v3795_v10 = vpop.permute.xlu0 %377  ;;  %v436_v40 = vmul.f32 %v3792_v8, %v3799_v12 }
  0xe3   : > { %v435_v33 = vmul.f32 %v3792_v8, %v3795_v10 }
  0xe5   : > { %v3815_v26 = vpop.permute.xlu1 %392 }
  0xe6   : > { %v3812_v20 = vpop.permute.xlu0 %387 }
  0xe9   : > { %v3834_v45 = vpop.permute.xlu1 %402 }
  0xea   : > { %v3826_v37 = vpop.permute.xlu0 %397 }
  0xeb   : > { %v439_v0 = vmul.f32 %v3792_v8, %v3826_v37 }
  0xee   : > { %v3848_v59 = vpop.permute.xlu0 %407 }
 0x13f   : > { %v2960_v15 = vpop.f32.mrb[0].mxu1 }
 0x140   : > { %v556_v17 = vadd.f32 %v2960_v15, %v431_v11  ;;  %v547_v18 = vpop.f32.mrb[1].mxu1  ;;  %v437_v11 = vmul.f32 %v3792_v8, %v3812_v20  ;;  %v3857_v15 = vpop.permute.xlu1 %412 }
 0x141   : > { %v548_v21 = vadd.f32 %v547_v18, %v429_v14  ;;  %v2961_v22 = vpop.f32.mrb[2].mxu1  ;;  %v438_v14 = vmul.f32 %v3792_v8, %v3815_v26  ;;  %v440_v18 = vmul.f32 %v3792_v8, %v3834_v45 }
 0x142   : > { %v616_v23 = vadd.f32 %v3804_v13, %v556_v17  ;;  %v559_v24 = vadd.f32 %v2961_v22, %v432_v16  ;;  %v550_v25 = vpop.f32.mrb[3].mxu1 }
 0x143   : > { %v614_v27 = vadd.f32 %v3804_v13, %v548_v21  ;;  %v551_v28 = vadd.f32 %v550_v25, %v430_v19 }
 0x144   : > { %v648_v29 = vmul.f32 0.01, %v616_v23  ;;  %v617_v30 = vadd.f32 %v3804_v13, %v559_v24  ;;  %vm632_vm2 = vcmp.gt.f32.partialorder %v616_v23, 0.0 }
 0x145   : > { %v646_v31 = vmul.f32 0.01, %v614_v27  ;;  %v615_v32 = vadd.f32 %v3804_v13, %v551_v28  ;;  %vm630_vm3 = vcmp.gt.f32.partialorder %v614_v27, 0.0 }
 0x146   : > { %vm633_vm4 = vcmp.gt.f32.partialorder %v617_v30, 0.0  ;;  %v649_v34 = vmul.f32 0.01, %v617_v30  ;;  %v3830_v41 = vsel %vm632_vm2, %v616_v23, %v648_v29 }
 0x147   : > { %vm631_vm5 = vcmp.gt.f32.partialorder %v615_v32, 0.0  ;;  %v647_v38 = vmul.f32 0.01, %v615_v32  ;;  %v2964_v39 = vpop.f32.mrb[4].mxu1  ;;  %v3839_v49 = vsel %vm630_vm3, %v614_v27, %v646_v31 }
 0x148   : > { %v3832_v42 = vsel %vm633_vm4, %v617_v30, %v649_v34  ;;  %v572_v43 = vadd.f32 %v2964_v39, %v435_v33  ;;  %v563_v44 = vpop.f32.mrb[5].mxu1  ;;  %v3876_v34 = vpop.permute.xlu0 %417 }
 0x149   : > { %v679_v46 = vpack.c.bf16 %v3832_v42, %v3830_v41  ;;  %v564_v47 = vadd.f32 %v563_v44, %v433_v35  ;;  %v2965_v48 = vpop.f32.mrb[6].mxu1  ;;  %v3841_v50 = vsel %vm631_vm5, %v615_v32, %v647_v38 }
 0x14a   : > { %v620_v51 = vadd.f32 %v3804_v13, %v572_v43  ;;  %v575_v52 = vadd.f32 %v2965_v48, %v436_v40  ;;  %v566_v53 = vpop.f32.mrb[7].mxu1  ;;  %v678_v54 = vpack.c.bf16 %v3841_v50, %v3839_v49  ;;  %v3880_v40 = vpop.permute.xlu1 %422  ;;  %v441_v48 = vmul.f32 %v3792_v8, %v3848_v59 }
 0x14b   : > { %v618_v55 = vadd.f32 %v3804_v13, %v564_v47  ;;  %v567_v56 = vadd.f32 %v566_v53, %v434_v36 }
 0x14c   : > { %v652_v57 = vmul.f32 0.01, %v620_v51  ;;  %v621_v58 = vadd.f32 %v3804_v13, %v575_v52  ;;  %2990 = vmatprep.mubr.bf16.mxu1 %v678_v54  ;;  %vm636_vm6 = vcmp.gt.f32.partialorder %v620_v51, 0.0  ;;  %v444_v54 = vmul.f32 %v3792_v8, %v3880_v40 }
 0x14d   : > { %v650_v60 = vmul.f32 0.01, %v618_v55  ;;  %v619_v61 = vadd.f32 %v3804_v13, %v567_v56  ;;  %2991 = vmatmul.mubr.bf16.vlgmr.msra.gmra.mrb[16].mxu1 %v679_v46  ;;  %vm634_vm7 = vcmp.gt.f32.partialorder %v618_v55, 0.0  ;;  %v443_v46 = vmul.f32 %v3792_v8, %v3876_v34 }
 0x14e   : > { %vm637_vm8 = vcmp.gt.f32.partialorder %v621_v58, 0.0  ;;  %v653_v4 = vmul.f32 0.01, %v621_v58  ;;  %v3862_v22 = vsel %vm636_vm6, %v620_v51, %v652_v57  ;;  %v442_v51 = vmul.f32 %v3792_v8, %v3857_v15 }
 0x14f   : > { %vm635_vm9 = vcmp.gt.f32.partialorder %v619_v61, 0.0  ;;  %v651_v16 = vmul.f32 0.01, %v619_v61  ;;  %v2968_v17 = vpop.f32.mrb[8].mxu1  ;;  %v3867_v27 = vsel %vm634_vm7, %v618_v55, %v650_v60 }
 0x150   : > { %v588_v19 = vadd.f32 %v2968_v17, %v439_v0  ;;  %v579_v21 = vpop.f32.mrb[9].mxu1  ;;  %v3864_v23 = vsel %vm637_vm8, %v621_v58, %v653_v4 }
 0x151   : > { %v580_v24 = vadd.f32 %v579_v21, %v437_v11  ;;  %v2969_v25 = vpop.f32.mrb[10].mxu1  ;;  %v3869_v28 = vsel %vm635_vm9, %v619_v61, %v651_v16  ;;  %v681_v29 = vpack.c.bf16 %v3864_v23, %v3862_v22 }
 0x152   : > { %v624_v30 = vadd.f32 %v3804_v13, %v588_v19  ;;  %v591_v31 = vadd.f32 %v2969_v25, %v440_v18  ;;  %v582_v32 = vpop.f32.mrb[11].mxu1  ;;  %v680_v33 = vpack.c.bf16 %v3869_v28, %v3867_v27 }
 0x153   : > { %v622_v35 = vadd.f32 %v3804_v13, %v580_v24  ;;  %v583_v36 = vadd.f32 %v582_v32, %v438_v14 }
 0x154   : > { %v656_v38 = vmul.f32 0.01, %v624_v30  ;;  %v625_v39 = vadd.f32 %v3804_v13, %v591_v31  ;;  %2994 = vmatprep.mubr.bf16.mxu1 %v680_v33  ;;  %vm640_vm10 = vcmp.gt.f32.partialorder %v624_v30, 0.0 }
 0x155   : > { %v654_v43 = vmul.f32 0.01, %v622_v35  ;;  %v623_v44 = vadd.f32 %v3804_v13, %v583_v36  ;;  %2995 = vmatmul.mubr.bf16.gmra.mrb[20].mxu1 %v681_v29  ;;  %vm638_vm11 = vcmp.gt.f32.partialorder %v622_v35, 0.0 }
 0x156   : > { %vm641_vm12 = vcmp.gt.f32.partialorder %v625_v39, 0.0  ;;  %v657_v47 = vmul.f32 0.01, %v625_v39  ;;  %v3892_v57 = vsel %vm640_vm10, %v624_v30, %v656_v38 }
 0x157   : > { %vm639_vm13 = vcmp.gt.f32.partialorder %v623_v44, 0.0  ;;  %v655_v52 = vmul.f32 0.01, %v623_v44  ;;  %v2972_v53 = vpop.f32.mrb[12].mxu1  ;;  %v3896_v0 = vsel %vm638_vm11, %v622_v35, %v654_v43  ;;  %v3391_v43 = vld [vmem:[#allocation2 + $0xa8] sm:$0xff]  }
 0x158   : > { %v604_v55 = vadd.f32 %v2972_v53, %v443_v46  ;;  %v595_v56 = vpop.f32.mrb[13].mxu1  ;;  %v3894_v58 = vsel %vm641_vm12, %v625_v39, %v657_v47  ;;  %v3390_v39 = vld [vmem:[#allocation2 + $0xa0] sm:$0xff]   ;;  %v3393_v46 = vld [vmem:[#allocation2 + $0xb8] sm:$0xff]   ;;  %v704_v53 = vsub.s32 1, %v3780_v2 }
 0x159   : > { %v596_v60 = vadd.f32 %v595_v56, %v441_v48  ;;  %v2973_v61 = vpop.f32.mrb[14].mxu1  ;;  %v3898_v4 = vsel %vm639_vm13, %v623_v44, %v655_v52  ;;  %v683_v11 = vpack.c.bf16 %v3894_v58, %v3892_v57  ;;  %3016 = vmatprep.subr.bf16.mxu0 %v3390_v39  ;;  %v3392_v44 = vld [vmem:[#allocation2 + $0xb0] sm:$0xff]   ;;  %v3394_v47 = vld [vmem:[#allocation2 + $0xc0] sm:$0xff]   ;;  %3038 = vmatprep.subr.bf16.mxu1 %v3393_v46  ;;  %v3395_v48 = vld [vmem:[#allocation2 + $0xc8] sm:$0xff]  }
 0x15a   : > { %v628_v14 = vadd.f32 %v3804_v13, %v604_v55  ;;  %v607_v16 = vadd.f32 %v2973_v61, %v444_v54  ;;  %v598_v8 = vpop.f32.mrb[15].mxu1  ;;  %v682_v17 = vpack.c.bf16 %v3898_v4, %v3896_v0  ;;  %3017 = vmatpush3.bf16.msra.mxu0 %v3390_v39  ;;  %3039 = vmatpush3.bf16.msra.mxu1 %v3393_v46  ;;  %v3397_v52 = vld [vmem:[#allocation2 + $0xd8] sm:$0xff]  }
 0x15b   : > { %v626_v18 = vadd.f32 %v3804_v13, %v596_v60  ;;  %v599_v19 = vadd.f32 %v598_v8, %v442_v51  ;;  %3018 = vmatprep.subr.bf16.mxu0 %v3391_v43  ;;  %3040 = vmatprep.subr.bf16.mxu1 %v3394_v47  ;;  %v3396_v51 = vld [vmem:[#allocation2 + $0xd0] sm:$0xff]   ;;  %v3924_v54 = vrot.slane %v3785_v5, %v704_v53 }
 0x15c   : > { %v660_v21 = vmul.f32 0.01, %v628_v14  ;;  %v629_v24 = vadd.f32 %v3804_v13, %v607_v16  ;;  %2998 = vmatprep.mubr.bf16.mxu1 %v682_v17  ;;  %vm644_vm14 = vcmp.gt.f32.partialorder %v628_v14, 0.0 }
 0x15d   : > { %v658_v25 = vmul.f32 0.01, %v626_v18  ;;  %v627_v29 = vadd.f32 %v3804_v13, %v599_v19  ;;  %2999 = vmatmul.mubr.bf16.gmra.mrb[24].mxu1 %v683_v11  ;;  %vm642_vm15 = vcmp.gt.f32.partialorder %v626_v18, 0.0 }
 0x15e   : > { %vm645_vm0 = vcmp.gt.f32.partialorder %v629_v24, 0.0  ;;  %v661_v30 = vmul.f32 0.01, %v629_v24  ;;  %v3908_v32 = vsel %vm644_vm14, %v628_v14, %v660_v21  ;;  %3019 = vmatpush3.bf16.msra.mxu0 %v3391_v43  ;;  %3041 = vmatpush3.bf16.msra.mxu1 %v3394_v47 }
 0x15f   : > { %vm643_vm1 = vcmp.gt.f32.partialorder %v627_v29, 0.0  ;;  %v659_v31 = vmul.f32 0.01, %v627_v29  ;;  %v3912_v35 = vsel %vm642_vm15, %v626_v18, %v658_v25  ;;  %3020 = vmatprep.subr.bf16.mxu0 %v3392_v44  ;;  %3042 = vmatprep.subr.bf16.mxu1 %v3395_v48 }
 0x160   : > { %v3910_v33 = vsel %vm645_vm0, %v629_v24, %v661_v30 }
 0x161   : > { %v3914_v36 = vsel %vm643_vm1, %v627_v29, %v659_v31  ;;  %v685_v38 = vpack.c.bf16 %v3910_v33, %v3908_v32 }
 0x162   : > { %v684_v13 = vpack.c.bf16 %v3914_v36, %v3912_v35  ;;  %3021 = vmatpush3.bf16.msra.mxu0 %v3392_v44  ;;  %3043 = vmatpush3.bf16.msra.mxu1 %v3395_v48 }
 0x163   : > { %3044 = vmatprep.subr.bf16.mxu1 %v3396_v51 }
 0x164   : > { %3002 = vmatprep.mubr.bf16.mxu1 %v684_v13 }
 0x165   : > { %3003 = vmatmul.mubr.bf16.gmra.mrb[28].mxu1 %v685_v38 }
 0x166   : > { %3045 = vmatpush3.bf16.msra.mxu1 %v3396_v51 }
 0x167   : > { %3046 = vmatprep.subr.bf16.mxu1 %v3397_v52 }
 0x16a   : > { %3047 = vmatpush3.bf16.msra.mxu1 %v3397_v52 }
 0x220   : > { %v2992_v55 = vpop.f32.mrb[16].mxu1 }
 0x221   : > { %v797_v56 = vadd.f32 %v2992_v55, %v3924_v54  ;;  %v788_v60 = vpop.f32.mrb[17].mxu1 }
 0x222   : > { %v789_v61 = vadd.f32 %v788_v60, %v3924_v54  ;;  %v2993_v11 = vpop.f32.mrb[18].mxu1 }
 0x223   : > { %v869_v14 = vmul.f32 0.01, %v797_v56  ;;  %v800_v16 = vadd.f32 %v2993_v11, %v3924_v54  ;;  %v791_v8 = vpop.f32.mrb[19].mxu1  ;;  %vm853_vm2 = vcmp.gt.f32.partialorder %v797_v56, 0.0 }
 0x224   : > { %v867_v17 = vmul.f32 0.01, %v789_v61  ;;  %v792_v18 = vadd.f32 %v791_v8, %v3924_v54  ;;  %vm851_vm4 = vcmp.gt.f32.partialorder %v789_v61, 0.0 }
 0x225   : > { %vm854_vm3 = vcmp.gt.f32.partialorder %v800_v16, 0.0  ;;  %v870_v19 = vmul.f32 0.01, %v800_v16  ;;  %v885_v24 = vsel %vm853_vm2, %v797_v56, %v869_v14 }
 0x226   : > { %v868_v21 = vmul.f32 0.01, %v792_v18  ;;  %vm852_vm5 = vcmp.gt.f32.partialorder %v792_v18, 0.0  ;;  %v883_v30 = vsel %vm851_vm4, %v789_v61, %v867_v17 }
 0x227   : > { %v886_v25 = vsel %vm854_vm3, %v800_v16, %v870_v19 }
 0x228   : > { %v2996_v29 = vpop.f32.mrb[20].mxu1  ;;  %v884_v31 = vsel %vm852_vm5, %v792_v18, %v868_v21  ;;  %v900_v38 = vpack.c.bf16 %v886_v25, %v885_v24 }
 0x229   : > { %v813_v13 = vadd.f32 %v2996_v29, %v3924_v54  ;;  %v804_v39 = vpop.f32.mrb[21].mxu1  ;;  %v899_v43 = vpack.c.bf16 %v884_v31, %v883_v30 }
 0x22a   : > { %v805_v44 = vadd.f32 %v804_v39, %v3924_v54  ;;  %v2997_v46 = vpop.f32.mrb[22].mxu1 }
 0x22b   : > { %v873_v47 = vmul.f32 0.01, %v813_v13  ;;  %v816_v48 = vadd.f32 %v2997_v46, %v3924_v54  ;;  %v807_v51 = vpop.f32.mrb[23].mxu1  ;;  %3022 = vmatprep.mubr.bf16.mxu0 %v899_v43  ;;  %vm857_vm6 = vcmp.gt.f32.partialorder %v813_v13, 0.0 }
 0x22c   : > { %v871_v52 = vmul.f32 0.01, %v805_v44  ;;  %v808_v55 = vadd.f32 %v807_v51, %v3924_v54  ;;  %3023 = vmatmul.mubr.bf16.vlgmr.msra.gmra.mrb[0].mxu0 %v900_v38  ;;  %vm855_vm7 = vcmp.gt.f32.partialorder %v805_v44, 0.0 }
 0x22d   : > { %vm858_vm8 = vcmp.gt.f32.partialorder %v816_v48, 0.0  ;;  %v874_v56 = vmul.f32 0.01, %v816_v48  ;;  %v889_v61 = vsel %vm857_vm6, %v813_v13, %v873_v47 }
 0x22e   : > { %vm856_vm9 = vcmp.gt.f32.partialorder %v808_v55, 0.0  ;;  %v872_v60 = vmul.f32 0.01, %v808_v55  ;;  %v887_v16 = vsel %vm855_vm7, %v805_v44, %v871_v52 }
 0x22f   : > { %v890_v11 = vsel %vm858_vm8, %v816_v48, %v874_v56 }
 0x230   : > { %v3000_v14 = vpop.f32.mrb[24].mxu1  ;;  %v888_v8 = vsel %vm856_vm9, %v808_v55, %v872_v60  ;;  %v902_v17 = vpack.c.bf16 %v890_v11, %v889_v61 }
 0x231   : > { %v829_v18 = vadd.f32 %v3000_v14, %v3924_v54  ;;  %v820_v19 = vpop.f32.mrb[25].mxu1  ;;  %v901_v21 = vpack.c.bf16 %v888_v8, %v887_v16 }
 0x232   : > { %v821_v24 = vadd.f32 %v820_v19, %v3924_v54  ;;  %v3001_v25 = vpop.f32.mrb[26].mxu1 }
 0x233   : > { %v877_v29 = vmul.f32 0.01, %v829_v18  ;;  %v832_v30 = vadd.f32 %v3001_v25, %v3924_v54  ;;  %v823_v31 = vpop.f32.mrb[27].mxu1  ;;  %3026 = vmatprep.mubr.bf16.mxu0 %v901_v21  ;;  %vm861_vm10 = vcmp.gt.f32.partialorder %v829_v18, 0.0 }
 0x234   : > { %v875_v38 = vmul.f32 0.01, %v821_v24  ;;  %v824_v13 = vadd.f32 %v823_v31, %v3924_v54  ;;  %3027 = vmatmul.mubr.bf16.gmra.mrb[4].mxu0 %v902_v17  ;;  %vm859_vm11 = vcmp.gt.f32.partialorder %v821_v24, 0.0 }
 0x235   : > { %vm862_vm12 = vcmp.gt.f32.partialorder %v832_v30, 0.0  ;;  %v878_v39 = vmul.f32 0.01, %v832_v30  ;;  %v893_v44 = vsel %vm861_vm10, %v829_v18, %v877_v29 }
 0x236   : > { %vm860_vm13 = vcmp.gt.f32.partialorder %v824_v13, 0.0  ;;  %v876_v43 = vmul.f32 0.01, %v824_v13  ;;  %v891_v48 = vsel %vm859_vm11, %v821_v24, %v875_v38 }
 0x237   : > { %v894_v46 = vsel %vm862_vm12, %v832_v30, %v878_v39  ;;  %v3399_v39 = vld [vmem:[#allocation2 + $0xe8] sm:$0xff]  }
 0x238   : > { %v3004_v47 = vpop.f32.mrb[28].mxu1  ;;  %v892_v51 = vsel %vm860_vm13, %v824_v13, %v876_v43  ;;  %v904_v52 = vpack.c.bf16 %v894_v46, %v893_v44  ;;  %v3398_v13 = vld [vmem:[#allocation2 + $0xe0] sm:$0xff]   ;;  %v925_v43 = vsub.s32 2, %v3780_v2  ;;  %v1122_v44 = vsub.s32 5, %v3780_v2 }
 0x239   : > { %v845_v55 = vadd.f32 %v3004_v47, %v3924_v54  ;;  %v836_v56 = vpop.f32.mrb[29].mxu1  ;;  %v903_v60 = vpack.c.bf16 %v892_v51, %v891_v48  ;;  %3048 = vmatprep.subr.bf16.mxu1 %v3398_v13 }
 0x23a   : > { %v837_v61 = vadd.f32 %v836_v56, %v3924_v54  ;;  %v3005_v11 = vpop.f32.mrb[30].mxu1  ;;  %3049 = vmatpush3.bf16.msra.mxu1 %v3398_v13  ;;  %v3945_v46 = vrot.slane %v3785_v5, %v925_v43  ;;  %v3948_v47 = vrot.slane %v3785_v5, %v1122_v44 }
 0x23b   : > { %v881_v14 = vmul.f32 0.01, %v845_v55  ;;  %v848_v16 = vadd.f32 %v3005_v11, %v3924_v54  ;;  %v839_v8 = vpop.f32.mrb[31].mxu1  ;;  %3030 = vmatprep.mubr.bf16.mxu0 %v903_v60  ;;  %vm865_vm14 = vcmp.gt.f32.partialorder %v845_v55, 0.0  ;;  %3050 = vmatprep.subr.bf16.mxu1 %v3399_v39 }
 0x23c   : > { %v879_v17 = vmul.f32 0.01, %v837_v61  ;;  %v840_v18 = vadd.f32 %v839_v8, %v3924_v54  ;;  %3031 = vmatmul.mubr.bf16.gmra.mrb[8].mxu0 %v904_v52  ;;  %vm863_vm15 = vcmp.gt.f32.partialorder %v837_v61, 0.0  ;;  %v3400_v54 = vld [vmem:[#allocation2 + $0xf0] sm:$0xff]   ;;  %v1130_v44 = vmul.f32 %v3948_v47, %v3862_v22 }
 0x23d   : > { %vm866_vm0 = vcmp.gt.f32.partialorder %v848_v16, 0.0  ;;  %v882_v19 = vmul.f32 0.01, %v848_v16  ;;  %v897_v24 = vsel %vm865_vm14, %v845_v55, %v881_v14  ;;  %v1131_v22 = vmul.f32 %v3948_v47, %v3864_v23 }
 0x23e   : > { %vm864_vm1 = vcmp.gt.f32.partialorder %v840_v18, 0.0  ;;  %v880_v21 = vmul.f32 0.01, %v840_v18  ;;  %v895_v29 = vsel %vm863_vm15, %v837_v61, %v879_v17  ;;  %3051 = vmatpush3.bf16.msra.mxu1 %v3399_v39  ;;  %v1126_v61 = vmul.f32 %v3948_v47, %v3830_v41 }
 0x23f   : > { %v898_v25 = vsel %vm866_vm0, %v848_v16, %v882_v19  ;;  %3052 = vmatprep.subr.bf16.mxu1 %v3400_v54  ;;  %v1124_v16 = vmul.f32 %v3948_v47, %v3839_v49 }
 0x240   : > { %v896_v30 = vsel %vm864_vm1, %v840_v18, %v880_v21  ;;  %v906_v31 = vpack.c.bf16 %v898_v25, %v897_v24  ;;  %v1127_v21 = vmul.f32 %v3948_v47, %v3832_v42 }
 0x241   : > { %v905_v38 = vpack.c.bf16 %v896_v30, %v895_v29  ;;  %v1125_v29 = vmul.f32 %v3948_v47, %v3841_v50 }
 0x242   : > { %3053 = vmatpush3.bf16.msra.mxu1 %v3400_v54 }
 0x243   : > { %3034 = vmatprep.mubr.bf16.mxu0 %v905_v38 }
 0x244   : > { %3035 = vmatmul.mubr.bf16.gmra.mrb[12].mxu0 %v906_v31 }
 0x2ff   : > { %v3024_v48 = vpop.f32.mrb[0].mxu0 }
 0x300   : > { %v1018_v51 = vadd.f32 %v3024_v48, %v3945_v46  ;;  %v1009_v52 = vpop.f32.mrb[1].mxu0 }
 0x301   : > { %v1010_v55 = vadd.f32 %v1009_v52, %v3945_v46  ;;  %v3025_v56 = vpop.f32.mrb[2].mxu0 }
 0x302   : > { %vm1074_vm2 = vcmp.gt.f32.partialorder %v1018_v51, 0.0  ;;  %v1090_v60 = vmul.f32 0.01, %v1018_v51  ;;  %v1021_v11 = vadd.f32 %v3025_v56, %v3945_v46  ;;  %v1012_v14 = vpop.f32.mrb[3].mxu0 }
 0x303   : > { %vm1072_vm3 = vcmp.gt.f32.partialorder %v1010_v55, 0.0  ;;  %v1088_v8 = vmul.f32 0.01, %v1010_v55  ;;  %v1013_v17 = vadd.f32 %v1012_v14, %v3945_v46 }
 0x304   : > { %v1106_v18 = vsel %vm1074_vm2, %v1018_v51, %v1090_v60  ;;  %vm1075_vm4 = vcmp.gt.f32.partialorder %v1021_v11, 0.0  ;;  %v1091_v19 = vmul.f32 0.01, %v1021_v11  ;;  %v1128_v60 = vmul.f32 %v3948_v47, %v3867_v27 }
 0x305   : > { %v1142_v24 = vadd.f32 %v1126_v61, %v1106_v18  ;;  %v1104_v25 = vsel %vm1072_vm3, %v1010_v55, %v1088_v8  ;;  %vm1073_vm5 = vcmp.gt.f32.partialorder %v1013_v17, 0.0  ;;  %v1089_v41 = vmul.f32 0.01, %v1013_v17 }
 0x306   : > { %v1107_v30 = vsel %vm1075_vm4, %v1021_v11, %v1091_v19  ;;  %v1140_v31 = vadd.f32 %v1124_v16, %v1104_v25  ;;  %v1129_v19 = vmul.f32 %v3948_v47, %v3869_v28  ;;  %vm1469_vm2 = vcmask 130048  }
 0x307   : > { %v1143_v49 = vadd.f32 %v1127_v21, %v1107_v30  ;;  %v1105_v38 = vsel %vm1073_vm5, %v1013_v17, %v1089_v41  ;;  %v3028_v13 = vpop.f32.mrb[4].mxu0 }
 0x308   : > { %v1034_v39 = vadd.f32 %v3028_v13, %v3945_v46  ;;  %v1025_v54 = vpop.f32.mrb[5].mxu0  ;;  %v1141_v43 = vadd.f32 %v1125_v29, %v1105_v38 }
 0x309   : > { %v1157_v42 = vpack.c.bf16 %v1143_v49, %v1142_v24  ;;  %v1026_v48 = vadd.f32 %v1025_v54, %v3945_v46  ;;  %v3029_v51 = vpop.f32.mrb[6].mxu0 }
 0x30a   : > { %vm1078_vm6 = vcmp.gt.f32.partialorder %v1034_v39, 0.0  ;;  %v1094_v52 = vmul.f32 0.01, %v1034_v39  ;;  %v1037_v50 = vadd.f32 %v3029_v51, %v3945_v46  ;;  %v1028_v55 = vpop.f32.mrb[7].mxu0  ;;  %v1156_v56 = vpack.c.bf16 %v1141_v43, %v1140_v31 }
 0x30b   : > { %vm1076_vm7 = vcmp.gt.f32.partialorder %v1026_v48, 0.0  ;;  %v1092_v61 = vmul.f32 0.01, %v1026_v48  ;;  %v1029_v11 = vadd.f32 %v1028_v55, %v3945_v46  ;;  %v1134_v31 = vmul.f32 %v3948_v47, %v3892_v57 }
 0x30c   : > { %v1110_v14 = vsel %vm1078_vm6, %v1034_v39, %v1094_v52  ;;  %vm1079_vm8 = vcmp.gt.f32.partialorder %v1037_v50, 0.0  ;;  %v1095_v16 = vmul.f32 0.01, %v1037_v50  ;;  %3054 = vmatprep.mubr.bf16.mxu1 %v1156_v56  ;;  %v1135_v57 = vmul.f32 %v3948_v47, %v3894_v58 }
 0x30d   : > { %v1108_v8 = vsel %vm1076_vm7, %v1026_v48, %v1092_v61  ;;  %vm1077_vm9 = vcmp.gt.f32.partialorder %v1029_v11, 0.0  ;;  %v1093_v17 = vmul.f32 0.01, %v1029_v11  ;;  %3055 = vmatmul.mubr.bf16.vlgmr.msra.gmra.mrb[32].mxu1 %v1157_v42  ;;  %v1146_v18 = vadd.f32 %v1130_v44, %v1110_v14 }
 0x30e   : > { %v1111_v27 = vsel %vm1079_vm8, %v1037_v50, %v1095_v16  ;;  %v1144_v21 = vadd.f32 %v1128_v60, %v1108_v8  ;;  %v1132_v44 = vmul.f32 %v3948_v47, %v3896_v0  ;;  %v1133_v60 = vmul.f32 %v3948_v47, %v3898_v4 }
 0x30f   : > { %v1109_v24 = vsel %vm1077_vm9, %v1029_v11, %v1093_v17  ;;  %v3032_v25 = vpop.f32.mrb[8].mxu0  ;;  %v1147_v41 = vadd.f32 %v1131_v22, %v1111_v27  ;;  %v1138_v17 = vmul.f32 %v3948_v47, %v3908_v32  ;;  %v1139_v32 = vmul.f32 %v3948_v47, %v3910_v33 }
 0x310   : > { %v1050_v29 = vadd.f32 %v3032_v25, %v3945_v46  ;;  %v1041_v23 = vpop.f32.mrb[9].mxu0  ;;  %v1145_v30 = vadd.f32 %v1129_v19, %v1109_v24  ;;  %v1182_v33 = vsub.s32 3, %v3780_v2 }
 0x311   : > { %v1042_v49 = vadd.f32 %v1041_v23, %v3945_v46  ;;  %v3033_v38 = vpop.f32.mrb[10].mxu0  ;;  %v1159_v13 = vpack.c.bf16 %v1147_v41, %v1146_v18  ;;  %v1136_v41 = vmul.f32 %v3948_v47, %v3912_v35 }
 0x312   : > { %vm1082_vm10 = vcmp.gt.f32.partialorder %v1050_v29, 0.0  ;;  %v1098_v39 = vmul.f32 0.01, %v1050_v29  ;;  %v1053_v28 = vadd.f32 %v3033_v38, %v3945_v46  ;;  %v1044_v54 = vpop.f32.mrb[11].mxu0  ;;  %v1158_v43 = vpack.c.bf16 %v1145_v30, %v1144_v21 }
 0x313   : > { %vm1080_vm11 = vcmp.gt.f32.partialorder %v1042_v49, 0.0  ;;  %v1096_v42 = vmul.f32 0.01, %v1042_v49  ;;  %v1045_v48 = vadd.f32 %v1044_v54, %v3945_v46 }
 0x314   : > { %v1114_v51 = vsel %vm1082_vm10, %v1050_v29, %v1098_v39  ;;  %vm1083_vm12 = vcmp.gt.f32.partialorder %v1053_v28, 0.0  ;;  %v1099_v52 = vmul.f32 0.01, %v1053_v28  ;;  %3058 = vmatprep.mubr.bf16.mxu1 %v1158_v43  ;;  %v1137_v39 = vmul.f32 %v3948_v47, %v3914_v36 }
 0x315   : > { %v1112_v50 = vsel %vm1080_vm11, %v1042_v49, %v1096_v42  ;;  %vm1081_vm13 = vcmp.gt.f32.partialorder %v1045_v48, 0.0  ;;  %v1097_v55 = vmul.f32 0.01, %v1045_v48  ;;  %3059 = vmatmul.mubr.bf16.gmra.mrb[36].mxu1 %v1159_v13  ;;  %v1150_v56 = vadd.f32 %v1134_v31, %v1114_v51 }
 0x316   : > { %v1115_v0 = vsel %vm1083_vm12, %v1053_v28, %v1099_v52  ;;  %v1148_v61 = vadd.f32 %v1132_v44, %v1112_v50 }
 0x317   : > { %v1113_v11 = vsel %vm1081_vm13, %v1045_v48, %v1097_v55  ;;  %v3036_v22 = vpop.f32.mrb[12].mxu0  ;;  %v1151_v14 = vadd.f32 %v1135_v57, %v1115_v0  ;;  %v1183_v48 = vrot.slane %v3785_v5, %v1182_v33 }
 0x318   : > { %v1066_v16 = vadd.f32 %v3036_v22, %v3945_v46  ;;  %v1057_v58 = vpop.f32.mrb[13].mxu0  ;;  %v1149_v8 = vadd.f32 %v1133_v60, %v1113_v11 }
 0x319   : > { %v1058_v18 = vadd.f32 %v1057_v58, %v3945_v46  ;;  %v3037_v19 = vpop.f32.mrb[14].mxu0  ;;  %v1161_v27 = vpack.c.bf16 %v1151_v14, %v1150_v56 }
 0x31a   : > { %vm1086_vm14 = vcmp.gt.f32.partialorder %v1066_v16, 0.0  ;;  %v1102_v21 = vmul.f32 0.01, %v1066_v16  ;;  %v1069_v4 = vadd.f32 %v3037_v19, %v3945_v46  ;;  %v1060_v24 = vpop.f32.mrb[15].mxu0  ;;  %v1160_v25 = vpack.c.bf16 %v1149_v8, %v1148_v61 }
 0x31b   : > { %vm1084_vm15 = vcmp.gt.f32.partialorder %v1058_v18, 0.0  ;;  %v1100_v29 = vmul.f32 0.01, %v1058_v18  ;;  %v1061_v23 = vadd.f32 %v1060_v24, %v3945_v46 }
 0x31c   : > { %v1118_v30 = vsel %vm1086_vm14, %v1066_v16, %v1102_v21  ;;  %vm1087_vm0 = vcmp.gt.f32.partialorder %v1069_v4, 0.0  ;;  %v1103_v31 = vmul.f32 0.01, %v1069_v4  ;;  %3062 = vmatprep.mubr.bf16.mxu1 %v1160_v25  ;;  %v3563_v25 = vmov 48  }
 0x31d   : > { %v1116_v49 = vsel %vm1084_vm15, %v1058_v18, %v1100_v29  ;;  %vm1085_vm1 = vcmp.gt.f32.partialorder %v1061_v23, 0.0  ;;  %v1101_v38 = vmul.f32 0.01, %v1061_v23  ;;  %3063 = vmatmul.mubr.bf16.gmra.mrb[40].mxu1 %v1161_v27  ;;  %v1154_v13 = vadd.f32 %v1138_v17, %v1118_v30  ;;  %3329 = vset.pattern.permute.xlu1 %v3563_v25 }
 0x31e   : > { %v1119_v35 = vsel %vm1087_vm0, %v1069_v4, %v1103_v31  ;;  %v1152_v28 = vadd.f32 %v1136_v41, %v1116_v49  ;;  %3328 = vset.pattern.permute.xlu0 %v3563_v25  ;;  %v3401_v31 = vld [vmem:[#allocation2 + $0xf8] sm:$0xff]  }
 0x31f   : > { %v1117_v54 = vsel %vm1085_vm1, %v1061_v23, %v1101_v38  ;;  %v1155_v43 = vadd.f32 %v1139_v32, %v1119_v35  ;;  %3070 = vmatprep.subr.bf16.mxu0 %v3401_v31 }
 0x320   : > { %v1153_v46 = vadd.f32 %v1137_v39, %v1117_v54  ;;  %3071 = vmatpush3.bf16.msra.mxu0 %v3401_v31 }
 0x321   : > { %v1163_v44 = vpack.c.bf16 %v1155_v43, %v1154_v13 }
 0x322   : > { %v1162_v42 = vpack.c.bf16 %v1153_v46, %v1152_v28 }
 0x324   : > { %3066 = vmatprep.mubr.bf16.mxu1 %v1162_v42 }
 0x325   : > { %3067 = vmatmul.mubr.bf16.gmra.mrb[44].mxu1 %v1163_v44 }
 0x3e0   : > { %v3056_v57 = vpop.f32.mrb[32].mxu1 }
 0x3e1   : > { %v1266_v51 = vpop.f32.mrb[33].mxu1  ;;  %v4006_v47 = vadd.f32 %v3056_v57, %v1183_v48 }
 0x3e2   : > { %v4000_v52 = vadd.f32 %v1266_v51, %v1183_v48  ;;  %v3057_v50 = vpop.f32.mrb[34].mxu1 }
 0x3e3   : > { %v1269_v55 = vpop.f32.mrb[35].mxu1  ;;  %v4010_v56 = vadd.f32 %v3057_v50, %v1183_v48  ;;  %v1331_v42 = vmul.f32 %v4006_v47, %v3776_v63 }
 0x3e4   : > { %v4002_v36 = vadd.f32 %v1269_v55, %v1183_v48  ;;  %1361 = vrot.lane.b32.xlu0 %v4000_v52, %s3562_s9  ;;  %v1329_v39 = vmul.f32 %v4000_v52, %v3774_v62 }
 0x3e5   : > { %v1332_v33 = vmul.f32 %v4010_v56, %v3782_v3 }
 0x3e6   : > { %1363 = vrot.lane.b32.xlu1 %v4002_v36, %s3562_s9  ;;  %v1330_v35 = vmul.f32 %v4002_v36, %v3778_v1 }
 0x3e8   : > { %v3060_v5 = vpop.f32.mrb[36].mxu1  ;;  %1365 = vrot.lane.b32.xlu0 %v4006_v47, %s3562_s9 }
 0x3e9   : > { %v1282_v60 = vpop.f32.mrb[37].mxu1  ;;  %v4022_v14 = vadd.f32 %v3060_v5, %v1183_v48 }
 0x3ea   : > { %v4014_v0 = vadd.f32 %v1282_v60, %v1183_v48  ;;  %v3061_v61 = vpop.f32.mrb[38].mxu1  ;;  %1367 = vrot.lane.b32.xlu1 %v4010_v56, %s3562_s9 }
 0x3eb   : > { %v1285_v11 = vpop.f32.mrb[39].mxu1  ;;  %v4026_v16 = vadd.f32 %v3061_v61, %v1183_v48 }
 0x3ec   : > { %v4018_v22 = vadd.f32 %v1285_v11, %v1183_v48  ;;  %1369 = vrot.lane.b32.xlu0 %v4014_v0, %s3562_s9  ;;  %v1333_v1 = vmul.f32 %v4014_v0, %v3787_v6  ;;  %v1335_v11 = vmul.f32 %v4022_v14, %v3795_v10 }
 0x3ee   : > { %1371 = vrot.lane.b32.xlu1 %v4018_v22, %s3562_s9  ;;  %v1334_v55 = vmul.f32 %v4018_v22, %v3789_v7 }
 0x3f0   : > { %v3064_v58 = vpop.f32.mrb[40].mxu1  ;;  %1373 = vrot.lane.b32.xlu0 %v4022_v14, %s3562_s9 }
 0x3f1   : > { %v1298_v8 = vpop.f32.mrb[41].mxu1  ;;  %v4038_v21 = vadd.f32 %v3064_v58, %v1183_v48  ;;  %v1336_v58 = vmul.f32 %v4026_v16, %v3799_v12 }
 0x3f2   : > { %v4030_v17 = vadd.f32 %v1298_v8, %v1183_v48  ;;  %v3065_v18 = vpop.f32.mrb[42].mxu1  ;;  %1375 = vrot.lane.b32.xlu1 %v4026_v16, %s3562_s9 }
 0x3f3   : > { %v1301_v19 = vpop.f32.mrb[43].mxu1  ;;  %v4042_v4 = vadd.f32 %v3065_v18, %v1183_v48  ;;  %v1339_v31 = vmul.f32 %v4038_v21, %v3826_v37 }
 0x3f4   : > { %v4034_v27 = vadd.f32 %v1301_v19, %v1183_v48  ;;  %1377 = vrot.lane.b32.xlu0 %v4030_v17, %s3562_s9 }
 0x3f6   : > { %1379 = vrot.lane.b32.xlu1 %v4034_v27, %s3562_s9  ;;  %v1338_v25 = vmul.f32 %v4034_v27, %v3815_v26 }
 0x3f8   : > { %v3068_v24 = vpop.f32.mrb[44].mxu1  ;;  %1381 = vrot.lane.b32.xlu0 %v4038_v21, %s3562_s9 }
 0x3f9   : > { %v1314_v41 = vpop.f32.mrb[45].mxu1  ;;  %v4054_v49 = vadd.f32 %v3068_v24, %v1183_v48  ;;  %v1337_v24 = vmul.f32 %v4030_v17, %v3812_v20 }
 0x3fa   : > { %v4046_v29 = vadd.f32 %v1314_v41, %v1183_v48  ;;  %v3069_v23 = vpop.f32.mrb[46].mxu1  ;;  %1383 = vrot.lane.b32.xlu1 %v4042_v4, %s3562_s9 }
 0x3fb   : > { %v1317_v32 = vpop.f32.mrb[47].mxu1  ;;  %v4058_v38 = vadd.f32 %v3069_v23, %v1183_v48 }
 0x3fc   : > { %v4050_v30 = vadd.f32 %v1317_v32, %v1183_v48  ;;  %1385 = vrot.lane.b32.xlu0 %v4046_v29, %s3562_s9 }
 0x3fe   : > { %1387 = vrot.lane.b32.xlu1 %v4050_v30, %s3562_s9 }
 0x400   : > { %1389 = vrot.lane.b32.xlu0 %v4054_v49, %s3562_s9 }
 0x402   : > { %1391 = vrot.lane.b32.xlu1 %v4058_v38, %s3562_s9 }
 0x456   : > { %v1362_v13 = vpop.permute.xlu0 %1361 }
 0x457   : > { %v1409_v54 = vadd.f32 %v1362_v13, %v1329_v39  ;;  %v1340_v13 = vmul.f32 %v4042_v4, %v3834_v45 }
 0x458   : > { %v1364_v28 = vpop.permute.xlu1 %1363 }
 0x459   : > { %v1410_v43 = vadd.f32 %v1364_v28, %v1330_v35 }
 0x45a   : > { %v1366_v46 = vpop.permute.xlu0 %1365 }
 0x45b   : > { %v1425_v44 = vpack.c.bf16 %v1410_v43, %v1409_v54  ;;  %v1411_v57 = vadd.f32 %v1366_v46, %v1331_v42  ;;  %v1341_v54 = vmul.f32 %v4046_v29, %v3848_v59  ;;  %v1342_v43 = vmul.f32 %v4050_v30, %v3857_v15 }
 0x45c   : > { %v1368_v48 = vpop.permute.xlu1 %1367  ;;  %v2334_v15 = vmul.f32 0.31622776, %v4000_v52 }
 0x45d   : > { %v1412_v51 = vadd.f32 %v1368_v48, %v1332_v33  ;;  %1447 = vrot.lane.b32.xlu0 %v1425_v44, %s3564_s10  ;;  %v1343_v33 = vmul.f32 %v4054_v49, %v3876_v34  ;;  %v1344_v48 = vmul.f32 %v4058_v38, %v3880_v40  ;;  %v3403_v34 = vld [vmem:[#allocation2 + $0x108] sm:$0xff]   ;;  %v3404_v40 = vld [vmem:[#allocation2 + $0x110] sm:$0xff]  }
 0x45e   : > { %v1370_v62 = vpop.permute.xlu0 %1369 }
 0x45f   : > { %v1426_v50 = vpack.c.bf16 %v1412_v51, %v1411_v57  ;;  %v1413_v60 = vadd.f32 %v1370_v62, %v1333_v1  ;;  %v2337_v1 = vmul.f32 0.31622776, %v4010_v56 }
 0x460   : > { %v1372_v5 = vpop.permute.xlu1 %1371 }
 0x461   : > { %v1414_v63 = vadd.f32 %v1372_v5, %v1334_v55  ;;  %1449 = vrot.lane.b32.xlu1 %v1426_v50, %s3564_s10  ;;  %v2335_v50 = vmul.f32 0.31622776, %v4002_v36  ;;  %v3402_v55 = vld [vmem:[#allocation2 + $0x100] sm:$0xff]   ;;  %v3405_v5 = vld [vmem:[#allocation2 + $0x118] sm:$0xff]  }
 0x462   : > { %v1374_v3 = vpop.permute.xlu0 %1373  ;;  %3088 = vmatprep.subr.bf16.mxu1 %v3402_v55 }
 0x463   : > { %v1427_v61 = vpack.c.bf16 %v1414_v63, %v1413_v60  ;;  %v1415_v18 = vadd.f32 %v1374_v3, %v1335_v11  ;;  %3089 = vmatpush3.bf16.msra.mxu1 %v3402_v55  ;;  %v3406_v60 = vld [vmem:[#allocation2 + $0x120] sm:$0xff]   ;;  %v3407_v63 = vld [vmem:[#allocation2 + $0x128] sm:$0xff]  }
 0x464   : > { %v1376_v8 = vpop.permute.xlu1 %1375  ;;  %3090 = vmatprep.subr.bf16.mxu1 %v3403_v34 }
 0x465   : > { %v1416_v19 = vadd.f32 %v1376_v8, %v1336_v58  ;;  %1451 = vrot.lane.b32.xlu0 %v1427_v61, %s3564_s10 }
 0x466   : > { %v1378_v6 = vpop.permute.xlu0 %1377 }
 0x467   : > { %v1428_v7 = vpack.c.bf16 %v1416_v19, %v1415_v18  ;;  %v1417_v23 = vadd.f32 %v1378_v6, %v1337_v24  ;;  %3091 = vmatpush3.bf16.msra.mxu1 %v3403_v34  ;;  %v3409_v24 = vld [vmem:[#allocation2 + $0x138] sm:$0xff]  }
 0x468   : > { %v1380_v41 = vpop.permute.xlu1 %1379  ;;  %3092 = vmatprep.subr.bf16.mxu1 %v3404_v40 }
 0x469   : > { %v1418_v32 = vadd.f32 %v1380_v41, %v1338_v25  ;;  %1453 = vrot.lane.b32.xlu1 %v1428_v7, %s3564_s10  ;;  %v3408_v7 = vld [vmem:[#allocation2 + $0x130] sm:$0xff]   ;;  %v3410_v25 = vld [vmem:[#allocation2 + $0x140] sm:$0xff]   ;;  %v3411_v41 = vld [vmem:[#allocation2 + $0x148] sm:$0xff]  }
 0x46a   : > { %v1382_v10 = vpop.permute.xlu0 %1381  ;;  %3120 = vmatprep.subr.bf16.mxu0 %v3410_v25 }
 0x46b   : > { %v1429_v12 = vpack.c.bf16 %v1418_v32, %v1417_v23  ;;  %v1419_v35 = vadd.f32 %v1382_v10, %v1339_v31  ;;  %3093 = vmatpush3.bf16.msra.mxu1 %v3404_v40  ;;  %v3412_v23 = vld [vmem:[#allocation2 + $0x150] sm:$0xff]   ;;  %v3413_v32 = vld [vmem:[#allocation2 + $0x158] sm:$0xff]   ;;  %v3414_v10 = vld [vmem:[#allocation2 + $0x160] sm:$0xff]   ;;  %v1437_v31 = vsub.s32 6, %v3780_v2 }
 0x46c   : > { %v1384_v39 = vpop.permute.xlu1 %1383  ;;  %3094 = vmatprep.subr.bf16.mxu1 %v3405_v5 }
 0x46d   : > { %v1420_v28 = vadd.f32 %v1384_v39, %v1340_v13  ;;  %1455 = vrot.lane.b32.xlu0 %v1429_v12, %s3564_s10  ;;  %v3415_v12 = vld [vmem:[#allocation2 + $0x168] sm:$0xff]   ;;  %v4116_v13 = vld [vmem:[#allocation5] sm:$0xff] }
 0x46e   : > { %v1386_v20 = vpop.permute.xlu0 %1385  ;;  %v4119_v39 = vrot.slane %v4116_v13, %v1437_v31 }
 0x46f   : > { %v1430_v26 = vpack.c.bf16 %v1420_v28, %v1419_v35  ;;  %v1421_v44 = vadd.f32 %v1386_v20, %v1341_v54  ;;  %3095 = vmatpush3.bf16.msra.mxu1 %v3405_v5 }
 0x470   : > { %v1388_v46 = vpop.permute.xlu1 %1387  ;;  %3096 = vmatprep.subr.bf16.mxu1 %v3406_v60 }
 0x471   : > { %v1422_v42 = vadd.f32 %v1388_v46, %v1342_v43  ;;  %1457 = vrot.lane.b32.xlu1 %v1430_v26, %s3564_s10 }
 0x472   : > { %v1390_v37 = vpop.permute.xlu0 %1389 }
 0x473   : > { %v1431_v45 = vpack.c.bf16 %v1422_v42, %v1421_v44  ;;  %v1423_v51 = vadd.f32 %v1390_v37, %v1343_v33  ;;  %3097 = vmatpush3.bf16.msra.mxu1 %v3406_v60 }
 0x474   : > { %v1392_v57 = vpop.permute.xlu1 %1391  ;;  %3098 = vmatprep.subr.bf16.mxu1 %v3407_v63 }
 0x475   : > { %v1424_v62 = vadd.f32 %v1392_v57, %v1344_v48  ;;  %1459 = vrot.lane.b32.xlu0 %v1431_v45, %s3564_s10 }
 0x477   : > { %v1432_v59 = vpack.c.bf16 %v1424_v62, %v1423_v51  ;;  %3099 = vmatpush3.bf16.msra.mxu1 %v3407_v63 }
 0x478   : > { %3100 = vmatprep.subr.bf16.mxu1 %v3408_v7 }
 0x479   : > { %1461 = vrot.lane.b32.xlu1 %v1432_v59, %s3564_s10  ;;  %2352 = vperm.xlu0 %3328, %v2334_v15  }
 0x47b   : > { %3101 = vmatpush3.bf16.msra.mxu1 %v3408_v7 }
 0x47c   : > { %3102 = vmatprep.subr.bf16.mxu1 %v3409_v24 }
 0x47d   : > { %2357 = vperm.xlu1 %3329, %v2335_v50   ;;  %2367 = vperm.xlu0 %3328, %v2337_v1  }
 0x47f   : > { %3103 = vmatpush3.bf16.msra.mxu1 %v3409_v24 }
 0x4cf   : > { %v1448_v3 = vpop.permute.xlu0 %1447 }
 0x4d0   : > { %3072 = vmatprep.mubr.msk.bf16.mxu0 %vm1469_vm2, %v1448_v3 }
 0x4d3   : > { %v1450_v61 = vpop.permute.xlu1 %1449 }
 0x4d4   : > { %3073 = vmatmul.mubr.msk.bf16.vlgmr.msra.gmra.mrb[16].mxu0 %vm1469_vm2, %v1450_v61 }
 0x4d5   : > { %3121 = vmatpush3.bf16.msra.mxu0 %v3410_v25 }
 0x4d6   : > { %3122 = vmatprep.subr.bf16.mxu0 %v3411_v41 }
 0x4d7   : > { %v1452_v11 = vpop.permute.xlu0 %1451 }
 0x4d8   : > { %3076 = vmatprep.mubr.msk.bf16.mxu0 %vm1469_vm2, %v1452_v11 }
 0x4d9   : > { %3123 = vmatpush3.bf16.msra.mxu0 %v3411_v41 }
 0x4da   : > { %3124 = vmatprep.subr.bf16.mxu0 %v3412_v23 }
 0x4db   : > { %v1454_v58 = vpop.permute.xlu1 %1453 }
 0x4dc   : > { %3077 = vmatmul.mubr.msk.bf16.gmra.mrb[20].mxu0 %vm1469_vm2, %v1454_v58 }
 0x4dd   : > { %3125 = vmatpush3.bf16.msra.mxu0 %v3412_v23 }
 0x4de   : > { %3126 = vmatprep.subr.bf16.mxu0 %v3413_v32 }
 0x4df   : > { %v1456_v8 = vpop.permute.xlu0 %1455 }
 0x4e0   : > { %3080 = vmatprep.mubr.msk.bf16.mxu0 %vm1469_vm2, %v1456_v8 }
 0x4e1   : > { %3127 = vmatpush3.bf16.msra.mxu0 %v3413_v32 }
 0x4e2   : > { %3128 = vmatprep.subr.bf16.mxu0 %v3414_v10 }
 0x4e3   : > { %v1458_v18 = vpop.permute.xlu1 %1457 }
 0x4e4   : > { %3081 = vmatmul.mubr.msk.bf16.gmra.mrb[24].mxu0 %vm1469_vm2, %v1458_v18 }
 0x4e5   : > { %3129 = vmatpush3.bf16.msra.mxu0 %v3414_v10 }
 0x4e6   : > { %3130 = vmatprep.subr.bf16.mxu0 %v3415_v12 }
 0x4e7   : > { %v1460_v19 = vpop.permute.xlu0 %1459 }
 0x4e8   : > { %3084 = vmatprep.mubr.msk.bf16.mxu0 %vm1469_vm2, %v1460_v19 }
 0x4e9   : > { %3131 = vmatpush3.bf16.msra.mxu0 %v3415_v12 }
 0x4eb   : > { %v1462_v6 = vpop.permute.xlu1 %1461 }
 0x4ec   : > { %3085 = vmatmul.mubr.msk.bf16.gmra.mrb[28].mxu0 %vm1469_vm2, %v1462_v6 }
 0x5a7   : > { %v3074_v35 = vpop.f32.mrb[16].mxu0 }
 0x5a8   : > { %v1537_v28 = vadd.f32 %v3074_v35, %v4119_v39  ;;  %v1528_v20 = vpop.f32.mrb[17].mxu0 }
 0x5a9   : > { %v1529_v26 = vadd.f32 %v1528_v20, %v4119_v39  ;;  %v3075_v54 = vpop.f32.mrb[18].mxu0 }
 0x5aa   : > { %v1609_v43 = vmul.f32 0.01, %v1537_v28  ;;  %v1540_v46 = vadd.f32 %v3075_v54, %v4119_v39  ;;  %v1531_v44 = vpop.f32.mrb[19].mxu0  ;;  %vm1593_vm3 = vcmp.gt.f32.partialorder %v1537_v28, 0.0 }
 0x5ab   : > { %v1607_v42 = vmul.f32 0.01, %v1529_v26  ;;  %v1532_v37 = vadd.f32 %v1531_v44, %v4119_v39  ;;  %vm1591_vm4 = vcmp.gt.f32.partialorder %v1529_v26, 0.0 }
 0x5ac   : > { %vm1594_vm5 = vcmp.gt.f32.partialorder %v1540_v46, 0.0  ;;  %v1610_v45 = vmul.f32 0.01, %v1540_v46  ;;  %v1625_v48 = vsel %vm1593_vm3, %v1537_v28, %v1609_v43 }
 0x5ad   : > { %vm1592_vm6 = vcmp.gt.f32.partialorder %v1532_v37, 0.0  ;;  %v1608_v33 = vmul.f32 0.01, %v1532_v37  ;;  %v1623_v59 = vsel %vm1591_vm4, %v1529_v26, %v1607_v42 }
 0x5ae   : > { %v1626_v57 = vsel %vm1594_vm5, %v1540_v46, %v1610_v45 }
 0x5af   : > { %v1640_v51 = vpack.c.bf16 %v1626_v57, %v1625_v48  ;;  %v3078_v62 = vpop.f32.mrb[20].mxu0  ;;  %v1624_v15 = vsel %vm1592_vm6, %v1532_v37, %v1608_v33 }
 0x5b0   : > { %v1553_v50 = vadd.f32 %v3078_v62, %v4119_v39  ;;  %v1544_v1 = vpop.f32.mrb[21].mxu0  ;;  %v1639_v55 = vpack.c.bf16 %v1624_v15, %v1623_v59 }
 0x5b1   : > { %v1545_v34 = vadd.f32 %v1544_v1, %v4119_v39  ;;  %v3079_v40 = vpop.f32.mrb[22].mxu0 }
 0x5b2   : > { %v1613_v5 = vmul.f32 0.01, %v1553_v50  ;;  %v1556_v60 = vadd.f32 %v3079_v40, %v4119_v39  ;;  %v1547_v63 = vpop.f32.mrb[23].mxu0  ;;  %3104 = vmatprep.mubr.bf16.mxu1 %v1639_v55  ;;  %vm1597_vm7 = vcmp.gt.f32.partialorder %v1553_v50, 0.0 }
 0x5b3   : > { %v1611_v3 = vmul.f32 0.01, %v1545_v34  ;;  %v1548_v61 = vadd.f32 %v1547_v63, %v4119_v39  ;;  %3105 = vmatmul.mubr.bf16.vlgmr.msra.gmra.mrb[48].mxu1 %v1640_v51  ;;  %vm1595_vm8 = vcmp.gt.f32.partialorder %v1545_v34, 0.0 }
 0x5b4   : > { %vm1598_vm9 = vcmp.gt.f32.partialorder %v1556_v60, 0.0  ;;  %v1614_v11 = vmul.f32 0.01, %v1556_v60  ;;  %v1629_v8 = vsel %vm1597_vm7, %v1553_v50, %v1613_v5 }
 0x5b5   : > { %vm1596_vm10 = vcmp.gt.f32.partialorder %v1548_v61, 0.0  ;;  %v1612_v58 = vmul.f32 0.01, %v1548_v61  ;;  %v1627_v6 = vsel %vm1595_vm8, %v1545_v34, %v1611_v3 }
 0x5b6   : > { %v1630_v18 = vsel %vm1598_vm9, %v1556_v60, %v1614_v11 }
 0x5b7   : > { %v3082_v19 = vpop.f32.mrb[24].mxu0  ;;  %v1628_v7 = vsel %vm1596_vm10, %v1548_v61, %v1612_v58  ;;  %v1642_v24 = vpack.c.bf16 %v1630_v18, %v1629_v8  ;;  %v3416_v58 = vld [vmem:[#allocation2 + $0x170] sm:$0xff]   ;;  %v3417_v8 = vld [vmem:[#allocation2 + $0x178] sm:$0xff]   ;;  %v3419_v18 = vld [vmem:[#allocation2 + $0x188] sm:$0xff]  }
 0x5b8   : > { %v1569_v25 = vadd.f32 %v3082_v19, %v4119_v39  ;;  %v1560_v41 = vpop.f32.mrb[25].mxu0  ;;  %v1641_v23 = vpack.c.bf16 %v1628_v7, %v1627_v6  ;;  %3132 = vmatprep.subr.bf16.mxu0 %v3416_v58  ;;  %v3420_v19 = vld [vmem:[#allocation2 + $0x190] sm:$0xff]   ;;  %v3421_v6 = vld [vmem:[#allocation2 + $0x198] sm:$0xff]   ;;  %v3422_v7 = vld [vmem:[#allocation2 + $0x1a0] sm:$0xff]  }
 0x5b9   : > { %v1561_v32 = vadd.f32 %v1560_v41, %v4119_v39  ;;  %v3083_v10 = vpop.f32.mrb[26].mxu0  ;;  %3133 = vmatpush3.bf16.msra.mxu0 %v3416_v58 }
 0x5ba   : > { %v1617_v12 = vmul.f32 0.01, %v1569_v25  ;;  %v1572_v31 = vadd.f32 %v3083_v10, %v4119_v39  ;;  %v1563_v35 = vpop.f32.mrb[27].mxu0  ;;  %3108 = vmatprep.mubr.bf16.mxu1 %v1641_v23  ;;  %vm1601_vm11 = vcmp.gt.f32.partialorder %v1569_v25, 0.0  ;;  %3134 = vmatprep.subr.bf16.mxu0 %v3417_v8 }
 0x5bb   : > { %v1615_v28 = vmul.f32 0.01, %v1561_v32  ;;  %v1564_v20 = vadd.f32 %v1563_v35, %v4119_v39  ;;  %3109 = vmatmul.mubr.bf16.gmra.mrb[52].mxu1 %v1642_v24  ;;  %vm1599_vm12 = vcmp.gt.f32.partialorder %v1561_v32, 0.0  ;;  %v3423_v24 = vld [vmem:[#allocation2 + $0x1a8] sm:$0xff]  }
 0x5bc   : > { %vm1602_vm13 = vcmp.gt.f32.partialorder %v1572_v31, 0.0  ;;  %v1618_v26 = vmul.f32 0.01, %v1572_v31  ;;  %v1633_v43 = vsel %vm1601_vm11, %v1569_v25, %v1617_v12  ;;  %v1665_v25 = vsub.s32 7, %v3780_v2 }
 0x5bd   : > { %vm1600_vm14 = vcmp.gt.f32.partialorder %v1564_v20, 0.0  ;;  %v1616_v54 = vmul.f32 0.01, %v1564_v20  ;;  %v1631_v42 = vsel %vm1599_vm12, %v1561_v32, %v1615_v28  ;;  %3135 = vmatpush3.bf16.msra.mxu0 %v3417_v8 }
 0x5be   : > { %v1634_v46 = vsel %vm1602_vm13, %v1572_v31, %v1618_v26  ;;  %v4139_v41 = vrot.slane %v4116_v13, %v1665_v25 }
 0x5bf   : > { %v3086_v44 = vpop.f32.mrb[28].mxu0  ;;  %v1632_v37 = vsel %vm1600_vm14, %v1564_v20, %v1616_v54  ;;  %v1644_v45 = vpack.c.bf16 %v1634_v46, %v1633_v43 }
 0x5c0   : > { %v1585_v33 = vadd.f32 %v3086_v44, %v4119_v39  ;;  %v1576_v48 = vpop.f32.mrb[29].mxu0  ;;  %v1643_v57 = vpack.c.bf16 %v1632_v37, %v1631_v42 }
 0x5c1   : > { %v1577_v51 = vadd.f32 %v1576_v48, %v4119_v39  ;;  %v3087_v62 = vpop.f32.mrb[30].mxu0 }
 0x5c2   : > { %v1621_v59 = vmul.f32 0.01, %v1585_v33  ;;  %v1588_v15 = vadd.f32 %v3087_v62, %v4119_v39  ;;  %v1579_v50 = vpop.f32.mrb[31].mxu0  ;;  %3112 = vmatprep.mubr.bf16.mxu1 %v1643_v57  ;;  %vm1605_vm15 = vcmp.gt.f32.partialorder %v1585_v33, 0.0 }
 0x5c3   : > { %v1619_v1 = vmul.f32 0.01, %v1577_v51  ;;  %v1580_v55 = vadd.f32 %v1579_v50, %v4119_v39  ;;  %3113 = vmatmul.mubr.bf16.gmra.mrb[56].mxu1 %v1644_v45  ;;  %vm1603_vm0 = vcmp.gt.f32.partialorder %v1577_v51, 0.0  ;;  %v3418_v39 = vld [vmem:[#allocation2 + $0x180] sm:$0xff]  }
 0x5c4   : > { %vm1606_vm1 = vcmp.gt.f32.partialorder %v1588_v15, 0.0  ;;  %v1622_v34 = vmul.f32 0.01, %v1588_v15  ;;  %v1637_v5 = vsel %vm1605_vm15, %v1585_v33, %v1621_v59  ;;  %3152 = vmatprep.subr.bf16.mxu1 %v3418_v39 }
 0x5c5   : > { %vm1604_vm2 = vcmp.gt.f32.partialorder %v1580_v55, 0.0  ;;  %v1620_v40 = vmul.f32 0.01, %v1580_v55  ;;  %v1635_v63 = vsel %vm1603_vm0, %v1577_v51, %v1619_v1  ;;  %3153 = vmatpush3.bf16.msra.mxu1 %v3418_v39 }
 0x5c6   : > { %v1638_v60 = vsel %vm1606_vm1, %v1588_v15, %v1622_v34  ;;  %3154 = vmatprep.subr.bf16.mxu1 %v3419_v18 }
 0x5c7   : > { %v1636_v3 = vsel %vm1604_vm2, %v1580_v55, %v1620_v40  ;;  %v1646_v61 = vpack.c.bf16 %v1638_v60, %v1637_v5 }
 0x5c8   : > { %v1645_v11 = vpack.c.bf16 %v1636_v3, %v1635_v63 }
 0x5c9   : > { %3155 = vmatpush3.bf16.msra.mxu1 %v3419_v18 }
 0x5ca   : > { %3116 = vmatprep.mubr.bf16.mxu1 %v1645_v11  ;;  %3156 = vmatprep.subr.bf16.mxu1 %v3420_v19 }
 0x5cb   : > { %3117 = vmatmul.mubr.bf16.gmra.mrb[60].mxu1 %v1646_v61 }
 0x5cd   : > { %3157 = vmatpush3.bf16.msra.mxu1 %v3420_v19 }
 0x5ce   : > { %3158 = vmatprep.subr.bf16.mxu1 %v3421_v6 }
 0x5d1   : > { %3159 = vmatpush3.bf16.msra.mxu1 %v3421_v6 }
 0x5d2   : > { %3160 = vmatprep.subr.bf16.mxu1 %v3422_v7 }
 0x5d5   : > { %3161 = vmatpush3.bf16.msra.mxu1 %v3422_v7 }
 0x5d6   : > { %3162 = vmatprep.subr.bf16.mxu1 %v3423_v24 }
 0x5d9   : > { %3163 = vmatpush3.bf16.msra.mxu1 %v3423_v24 }
 0x686   : > { %v3106_v23 = vpop.f32.mrb[48].mxu1 }
 0x687   : > { %v1758_v32 = vadd.f32 %v3106_v23, %v4139_v41  ;;  %v1749_v10 = vpop.f32.mrb[49].mxu1 }
 0x688   : > { %v1750_v12 = vadd.f32 %v1749_v10, %v4139_v41  ;;  %v3107_v31 = vpop.f32.mrb[50].mxu1 }
 0x689   : > { %v1830_v35 = vmul.f32 0.01, %v1758_v32  ;;  %v1761_v28 = vadd.f32 %v3107_v31, %v4139_v41  ;;  %v1752_v20 = vpop.f32.mrb[51].mxu1  ;;  %vm1814_vm3 = vcmp.gt.f32.partialorder %v1758_v32, 0.0 }
 0x68a   : > { %v1828_v26 = vmul.f32 0.01, %v1750_v12  ;;  %v1753_v54 = vadd.f32 %v1752_v20, %v4139_v41  ;;  %vm1812_vm4 = vcmp.gt.f32.partialorder %v1750_v12, 0.0 }
 0x68b   : > { %vm1815_vm5 = vcmp.gt.f32.partialorder %v1761_v28, 0.0  ;;  %v1831_v43 = vmul.f32 0.01, %v1761_v28  ;;  %v1846_v46 = vsel %vm1814_vm3, %v1758_v32, %v1830_v35 }
 0x68c   : > { %vm1813_vm6 = vcmp.gt.f32.partialorder %v1753_v54, 0.0  ;;  %v1829_v13 = vmul.f32 0.01, %v1753_v54  ;;  %v1844_v45 = vsel %vm1812_vm4, %v1750_v12, %v1828_v26 }
 0x68d   : > { %v1847_v44 = vsel %vm1815_vm5, %v1761_v28, %v1831_v43 }
 0x68e   : > { %v1861_v42 = vpack.c.bf16 %v1847_v44, %v1846_v46  ;;  %v3110_v37 = vpop.f32.mrb[52].mxu1  ;;  %v1845_v33 = vsel %vm1813_vm6, %v1753_v54, %v1829_v13 }
 0x68f   : > { %v1774_v48 = vadd.f32 %v3110_v37, %v4139_v41  ;;  %v1765_v57 = vpop.f32.mrb[53].mxu1  ;;  %v1860_v51 = vpack.c.bf16 %v1845_v33, %v1844_v45 }
 0x690   : > { %v1766_v62 = vadd.f32 %v1765_v57, %v4139_v41  ;;  %v3111_v59 = vpop.f32.mrb[54].mxu1 }
 0x691   : > { %v1834_v15 = vmul.f32 0.01, %v1774_v48  ;;  %v1777_v50 = vadd.f32 %v3111_v59, %v4139_v41  ;;  %v1768_v1 = vpop.f32.mrb[55].mxu1  ;;  %3136 = vmatprep.mubr.bf16.mxu0 %v1860_v51  ;;  %vm1818_vm7 = vcmp.gt.f32.partialorder %v1774_v48, 0.0 }
 0x692   : > { %v1832_v55 = vmul.f32 0.01, %v1766_v62  ;;  %v1769_v34 = vadd.f32 %v1768_v1, %v4139_v41  ;;  %3137 = vmatmul.mubr.bf16.vlgmr.msra.gmra.mrb[32].mxu0 %v1861_v42  ;;  %vm1816_vm8 = vcmp.gt.f32.partialorder %v1766_v62, 0.0 }
 0x693   : > { %vm1819_vm9 = vcmp.gt.f32.partialorder %v1777_v50, 0.0  ;;  %v1835_v40 = vmul.f32 0.01, %v1777_v50  ;;  %v1850_v60 = vsel %vm1818_vm7, %v1774_v48, %v1834_v15 }
 0x694   : > { %vm1817_vm10 = vcmp.gt.f32.partialorder %v1769_v34, 0.0  ;;  %v1833_v5 = vmul.f32 0.01, %v1769_v34  ;;  %v1848_v61 = vsel %vm1816_vm8, %v1766_v62, %v1832_v55 }
 0x695   : > { %v1851_v63 = vsel %vm1819_vm9, %v1777_v50, %v1835_v40  ;;  %v3424_v40 = vld [vmem:[#allocation2 + $0x1b0] sm:$0xff]  }
 0x696   : > { %v3114_v3 = vpop.f32.mrb[56].mxu1  ;;  %v1849_v11 = vsel %vm1817_vm10, %v1769_v34, %v1833_v5  ;;  %v1863_v58 = vpack.c.bf16 %v1851_v63, %v1850_v60  ;;  %3164 = vmatprep.subr.bf16.mxu1 %v3424_v40  ;;  %v3425_v5 = vld [vmem:[#allocation2 + $0x1b8] sm:$0xff]  }
 0x697   : > { %v1790_v8 = vadd.f32 %v3114_v3, %v4139_v41  ;;  %v1781_v39 = vpop.f32.mrb[57].mxu1  ;;  %v1862_v18 = vpack.c.bf16 %v1849_v11, %v1848_v61  ;;  %3165 = vmatpush3.bf16.msra.mxu1 %v3424_v40 }
 0x698   : > { %v1782_v19 = vadd.f32 %v1781_v39, %v4139_v41  ;;  %v3115_v6 = vpop.f32.mrb[58].mxu1  ;;  %3166 = vmatprep.subr.bf16.mxu1 %v3425_v5 }
 0x699   : > { %v1838_v7 = vmul.f32 0.01, %v1790_v8  ;;  %v1793_v24 = vadd.f32 %v3115_v6, %v4139_v41  ;;  %v1784_v25 = vpop.f32.mrb[59].mxu1  ;;  %3140 = vmatprep.mubr.bf16.mxu0 %v1862_v18  ;;  %vm1822_vm11 = vcmp.gt.f32.partialorder %v1790_v8, 0.0 }
 0x69a   : > { %v1836_v23 = vmul.f32 0.01, %v1782_v19  ;;  %v1785_v32 = vadd.f32 %v1784_v25, %v4139_v41  ;;  %3141 = vmatmul.mubr.bf16.gmra.mrb[36].mxu0 %v1863_v58  ;;  %vm1820_vm12 = vcmp.gt.f32.partialorder %v1782_v19, 0.0 }
 0x69b   : > { %vm1823_vm13 = vcmp.gt.f32.partialorder %v1793_v24, 0.0  ;;  %v1839_v10 = vmul.f32 0.01, %v1793_v24  ;;  %v1854_v31 = vsel %vm1822_vm11, %v1790_v8, %v1838_v7  ;;  %3167 = vmatpush3.bf16.msra.mxu1 %v3425_v5 }
 0x69c   : > { %vm1821_vm14 = vcmp.gt.f32.partialorder %v1785_v32, 0.0  ;;  %v1837_v12 = vmul.f32 0.01, %v1785_v32  ;;  %v1852_v20 = vsel %vm1820_vm12, %v1782_v19, %v1836_v23 }
 0x69d   : > { %v1855_v35 = vsel %vm1823_vm13, %v1793_v24, %v1839_v10 }
 0x69e   : > { %v3118_v28 = vpop.f32.mrb[60].mxu1  ;;  %v1853_v26 = vsel %vm1821_vm14, %v1785_v32, %v1837_v12  ;;  %v1865_v54 = vpack.c.bf16 %v1855_v35, %v1854_v31 }
 0x69f   : > { %v1806_v43 = vadd.f32 %v3118_v28, %v4139_v41  ;;  %v1797_v13 = vpop.f32.mrb[61].mxu1  ;;  %v1864_v46 = vpack.c.bf16 %v1853_v26, %v1852_v20 }
 0x6a0   : > { %v1798_v44 = vadd.f32 %v1797_v13, %v4139_v41  ;;  %v3119_v42 = vpop.f32.mrb[62].mxu1 }
 0x6a1   : > { %v1842_v37 = vmul.f32 0.01, %v1806_v43  ;;  %v1809_v45 = vadd.f32 %v3119_v42, %v4139_v41  ;;  %v1800_v33 = vpop.f32.mrb[63].mxu1  ;;  %3144 = vmatprep.mubr.bf16.mxu0 %v1864_v46  ;;  %vm1826_vm15 = vcmp.gt.f32.partialorder %v1806_v43, 0.0 }
 0x6a2   : > { %v1840_v48 = vmul.f32 0.01, %v1798_v44  ;;  %v1801_v57 = vadd.f32 %v1800_v33, %v4139_v41  ;;  %3145 = vmatmul.mubr.bf16.gmra.mrb[40].mxu0 %v1865_v54  ;;  %vm1824_vm0 = vcmp.gt.f32.partialorder %v1798_v44, 0.0  ;;  %v4157_v41 = vld [vmem:[#allocation5 + $0x8] sm:$0xff] }
 0x6a3   : > { %vm1827_vm1 = vcmp.gt.f32.partialorder %v1809_v45, 0.0  ;;  %v1843_v51 = vmul.f32 0.01, %v1809_v45  ;;  %v1858_v59 = vsel %vm1826_vm15, %v1806_v43, %v1842_v37  ;;  %v4162_v60 = vrot.slane %v4157_v41, %v612_v9 }
 0x6a4   : > { %vm1825_vm2 = vcmp.gt.f32.partialorder %v1801_v57, 0.0  ;;  %v1841_v62 = vmul.f32 0.01, %v1801_v57  ;;  %v1856_v50 = vsel %vm1824_vm0, %v1798_v44, %v1840_v48 }
 0x6a5   : > { %v1859_v15 = vsel %vm1827_vm1, %v1809_v45, %v1843_v51 }
 0x6a6   : > { %v1857_v1 = vsel %vm1825_vm2, %v1801_v57, %v1841_v62  ;;  %v1867_v55 = vpack.c.bf16 %v1859_v15, %v1858_v59 }
 0x6a7   : > { %v1866_v34 = vpack.c.bf16 %v1857_v1, %v1856_v50 }
 0x6a9   : > { %3148 = vmatprep.mubr.bf16.mxu0 %v1866_v34 }
 0x6aa   : > { %3149 = vmatmul.mubr.bf16.gmra.mrb[44].mxu0 %v1867_v55 }
 0x765   : > { %v3138_v63 = vpop.f32.mrb[32].mxu0 }
 0x766   : > { %v1979_v3 = vadd.f32 %v3138_v63, %v4162_v60  ;;  %v1970_v61 = vpop.f32.mrb[33].mxu0 }
 0x767   : > { %v1971_v11 = vadd.f32 %v1970_v61, %v4162_v60  ;;  %v3139_v58 = vpop.f32.mrb[34].mxu0 }
 0x768   : > { %v2051_v8 = vmul.f32 0.01, %v1979_v3  ;;  %v1982_v39 = vadd.f32 %v3139_v58, %v4162_v60  ;;  %v1973_v18 = vpop.f32.mrb[35].mxu0  ;;  %vm2035_vm3 = vcmp.gt.f32.partialorder %v1979_v3, 0.0 }
 0x769   : > { %v2049_v19 = vmul.f32 0.01, %v1971_v11  ;;  %v1974_v6 = vadd.f32 %v1973_v18, %v4162_v60  ;;  %vm2033_vm4 = vcmp.gt.f32.partialorder %v1971_v11, 0.0 }
 0x76a   : > { %vm2036_vm5 = vcmp.gt.f32.partialorder %v1982_v39, 0.0  ;;  %v2052_v7 = vmul.f32 0.01, %v1982_v39  ;;  %v2067_v24 = vsel %vm2035_vm3, %v1979_v3, %v2051_v8  ;;  %vm3568_vm3 = vmmov 0  }
 0x76b   : > { %vm2034_vm6 = vcmp.gt.f32.partialorder %v1974_v6, 0.0  ;;  %v2050_v9 = vmul.f32 0.01, %v1974_v6  ;;  %v2065_v10 = vsel %vm2033_vm4, %v1971_v11, %v2049_v19  ;;  %vm2494_vm4 = vcmask 80896  }
 0x76c   : > { %v2068_v25 = vsel %vm2036_vm5, %v1982_v39, %v2052_v7  ;;  %vm4257_vm5 = vmpackc.low %vm2494_vm4, %vm2494_vm4 }
 0x76d   : > { %v2082_v23 = vpack.c.bf16 %v2068_v25, %v2067_v24  ;;  %v3142_v32 = vpop.f32.mrb[36].mxu0  ;;  %v2066_v12 = vsel %vm2034_vm6, %v1974_v6, %v2050_v9 }
 0x76e   : > { %v1995_v31 = vadd.f32 %v3142_v32, %v4162_v60  ;;  %v1986_v35 = vpop.f32.mrb[37].mxu0  ;;  %v2081_v28 = vpack.c.bf16 %v2066_v12, %v2065_v10 }
 0x76f   : > { %v1987_v20 = vadd.f32 %v1986_v35, %v4162_v60  ;;  %v3143_v26 = vpop.f32.mrb[38].mxu0 }
 0x770   : > { %v2055_v54 = vmul.f32 0.01, %v1995_v31  ;;  %v1998_v43 = vadd.f32 %v3143_v26, %v4162_v60  ;;  %v1989_v13 = vpop.f32.mrb[39].mxu0  ;;  %3168 = vmatprep.mubr.bf16.mxu1 %v2081_v28  ;;  %vm2039_vm7 = vcmp.gt.f32.partialorder %v1995_v31, 0.0 }
 0x771   : > { %v2053_v46 = vmul.f32 0.01, %v1987_v20  ;;  %v1990_v44 = vadd.f32 %v1989_v13, %v4162_v60  ;;  %3169 = vmatmul.mubr.bf16.vlgmr.msra.gmra.mrb[64].mxu1 %v2082_v23  ;;  %vm2037_vm8 = vcmp.gt.f32.partialorder %v1987_v20, 0.0 }
 0x772   : > { %vm2040_vm9 = vcmp.gt.f32.partialorder %v1998_v43, 0.0  ;;  %v2056_v42 = vmul.f32 0.01, %v1998_v43  ;;  %v2071_v45 = vsel %vm2039_vm7, %v1995_v31, %v2055_v54 }
 0x773   : > { %vm2038_vm10 = vcmp.gt.f32.partialorder %v1990_v44, 0.0  ;;  %v2054_v37 = vmul.f32 0.01, %v1990_v44  ;;  %v2069_v57 = vsel %vm2037_vm8, %v1987_v20, %v2053_v46 }
 0x774   : > { %v2072_v33 = vsel %vm2040_vm9, %v1998_v43, %v2056_v42  ;;  %v4183_v42 = vrot.slane %v4157_v41, %v704_v53 }
 0x775   : > { %v3146_v48 = vpop.f32.mrb[40].mxu0  ;;  %v2070_v51 = vsel %vm2038_vm10, %v1990_v44, %v2054_v37  ;;  %v2084_v62 = vpack.c.bf16 %v2072_v33, %v2071_v45 }
 0x776   : > { %v2011_v59 = vadd.f32 %v3146_v48, %v4162_v60  ;;  %v2002_v15 = vpop.f32.mrb[41].mxu0  ;;  %v2083_v50 = vpack.c.bf16 %v2070_v51, %v2069_v57  ;;  %v2336_v51 = vmul.f32 0.31622776, %v4006_v47 }
 0x777   : > { %v2003_v1 = vadd.f32 %v2002_v15, %v4162_v60  ;;  %v3147_v55 = vpop.f32.mrb[42].mxu0 }
 0x778   : > { %v2059_v34 = vmul.f32 0.01, %v2011_v59  ;;  %v2014_v40 = vadd.f32 %v3147_v55, %v4162_v60  ;;  %v2005_v5 = vpop.f32.mrb[43].mxu0  ;;  %3172 = vmatprep.mubr.bf16.mxu1 %v2083_v50  ;;  %vm2043_vm11 = vcmp.gt.f32.partialorder %v2011_v59, 0.0  ;;  %v2339_v50 = vmul.f32 0.31622776, %v4018_v22 }
 0x779   : > { %v2057_v63 = vmul.f32 0.01, %v2003_v1  ;;  %v2006_v3 = vadd.f32 %v2005_v5, %v4162_v60  ;;  %3173 = vmatmul.mubr.bf16.gmra.mrb[68].mxu1 %v2084_v62  ;;  %vm2041_vm12 = vcmp.gt.f32.partialorder %v2003_v1, 0.0 }
 0x77a   : > { %vm2044_vm13 = vcmp.gt.f32.partialorder %v2014_v40, 0.0  ;;  %v2060_v61 = vmul.f32 0.01, %v2014_v40  ;;  %v2075_v58 = vsel %vm2043_vm11, %v2011_v59, %v2059_v34  ;;  %v2341_v34 = vmul.f32 0.31622776, %v4026_v16 }
 0x77b   : > { %vm2042_vm14 = vcmp.gt.f32.partialorder %v2006_v3, 0.0  ;;  %v2058_v11 = vmul.f32 0.01, %v2006_v3  ;;  %v2073_v18 = vsel %vm2041_vm12, %v2003_v1, %v2057_v63  ;;  %v2338_v1 = vmul.f32 0.31622776, %v4014_v0 }
 0x77c   : > { %v2076_v8 = vsel %vm2044_vm13, %v2014_v40, %v2060_v61 }
 0x77d   : > { %v3150_v39 = vpop.f32.mrb[44].mxu0  ;;  %v2074_v19 = vsel %vm2042_vm14, %v2006_v3, %v2058_v11  ;;  %v2086_v6 = vpack.c.bf16 %v2076_v8, %v2075_v58  ;;  %v2340_v11 = vmul.f32 0.31622776, %v4022_v14 }
 0x77e   : > { %v2027_v7 = vadd.f32 %v3150_v39, %v4162_v60  ;;  %v2018_v9 = vpop.f32.mrb[45].mxu0  ;;  %v2085_v24 = vpack.c.bf16 %v2074_v19, %v2073_v18 }
 0x77f   : > { %v2019_v25 = vadd.f32 %v2018_v9, %v4162_v60  ;;  %v3151_v23 = vpop.f32.mrb[46].mxu0  ;;  %v2342_v9 = vmul.f32 0.31622776, %v4030_v17 }
 0x780   : > { %v2063_v32 = vmul.f32 0.01, %v2027_v7  ;;  %v2030_v10 = vadd.f32 %v3151_v23, %v4162_v60  ;;  %v2021_v12 = vpop.f32.mrb[47].mxu0  ;;  %3176 = vmatprep.mubr.bf16.mxu1 %v2085_v24  ;;  %vm2047_vm15 = vcmp.gt.f32.partialorder %v2027_v7, 0.0  ;;  %v2345_v24 = vmul.f32 0.31622776, %v4042_v4 }
 0x781   : > { %v2061_v31 = vmul.f32 0.01, %v2019_v25  ;;  %v2022_v35 = vadd.f32 %v2021_v12, %v4162_v60  ;;  %3177 = vmatmul.mubr.bf16.gmra.mrb[72].mxu1 %v2086_v6  ;;  %vm2045_vm0 = vcmp.gt.f32.partialorder %v2019_v25, 0.0 }
 0x782   : > { %vm2048_vm1 = vcmp.gt.f32.partialorder %v2030_v10, 0.0  ;;  %v2064_v28 = vmul.f32 0.01, %v2030_v10  ;;  %v2079_v26 = vsel %vm2047_vm15, %v2027_v7, %v2063_v32  ;;  %v2343_v7 = vmul.f32 0.31622776, %v4034_v27 }
 0x783   : > { %vm2046_vm2 = vcmp.gt.f32.partialorder %v2022_v35, 0.0  ;;  %v2062_v20 = vmul.f32 0.01, %v2022_v35  ;;  %v2077_v43 = vsel %vm2045_vm0, %v2019_v25, %v2061_v31  ;;  %v2344_v32 = vmul.f32 0.31622776, %v4038_v21 }
 0x784   : > { %v2080_v54 = vsel %vm2048_vm1, %v2030_v10, %v2064_v28  ;;  %v2347_v31 = vmul.f32 0.31622776, %v4050_v30 }
 0x785   : > { %v2078_v13 = vsel %vm2046_vm2, %v2022_v35, %v2062_v20  ;;  %v2088_v46 = vpack.c.bf16 %v2080_v54, %v2079_v26  ;;  %v2346_v35 = vmul.f32 0.31622776, %v4046_v29  ;;  %v2349_v26 = vmul.f32 0.31622776, %v4058_v38 }
 0x786   : > { %v2087_v44 = vpack.c.bf16 %v2078_v13, %v2077_v43  ;;  %v2348_v54 = vmul.f32 0.31622776, %v4054_v49 }
 0x788   : > { %3180 = vmatprep.mubr.bf16.mxu1 %v2087_v44  ;;  %v2358_v44 = vpop.permute.xlu1 %2357 }
 0x789   : > { %3181 = vmatmul.mubr.bf16.gmra.mrb[76].mxu1 %v2088_v46  ;;  %v2353_v46 = vpop.permute.xlu0 %2352 }
 0x844   : > { %v3170_v60 = vpop.f32.mrb[64].mxu1 }
 0x845   : > { %v2191_v37 = vpop.f32.mrb[65].mxu1  ;;  %v2200_v41 = vadd.f32 %v3170_v60, %v4183_v42  ;;  %v2368_v60 = vpop.permute.xlu0 %2367 }
 0x846   : > { %v2192_v45 = vadd.f32 %v2191_v37, %v4183_v42  ;;  %v3171_v33 = vpop.f32.mrb[66].mxu1  ;;  %v3566_v37 = vmov 0.0|0.0  }
 0x847   : > { %v2194_v48 = vpop.f32.mrb[67].mxu1  ;;  %v2203_v2 = vadd.f32 %v3171_v33, %v4183_v42  ;;  %3219 = vmatprep.subr.bf16.mxu0 %v3566_v37 }
 0x848   : > { %v2195_v57 = vadd.f32 %v2194_v48, %v4183_v42  ;;  %2270 = vrot.lane.b32.xlu1 %v2192_v45, %s3565_s11 }
 0x84a   : > { %2272 = vrot.lane.b32.xlu0 %v2195_v57, %s3565_s11 }
 0x84c   : > { %v3174_v62 = vpop.f32.mrb[68].mxu1  ;;  %2362 = vperm.xlu1 %3329, %v2336_v51  }
 0x84d   : > { %v2207_v53 = vpop.f32.mrb[69].mxu1  ;;  %v2216_v18 = vadd.f32 %v3174_v62, %v4183_v42 }
 0x84e   : > { %v3175_v59 = vpop.f32.mrb[70].mxu1  ;;  %2276 = vrot.lane.b32.xlu0 %v2203_v2, %s3565_s11  ;;  %v2208_v5 = vadd.f32 %v2207_v53, %v4183_v42 }
 0x84f   : > { %v2210_v15 = vpop.f32.mrb[71].mxu1  ;;  %v2219_v58 = vadd.f32 %v3175_v59, %v4183_v42 }
 0x850   : > { %2274 = vrot.lane.b32.xlu1 %v2200_v41, %s3565_s11  ;;  %v2211_v61 = vadd.f32 %v2210_v15, %v4183_v42 }
 0x852   : > { %2377 = vperm.xlu0 %3328, %v2339_v50  }
 0x854   : > { %v3178_v55 = vpop.f32.mrb[72].mxu1  ;;  %2372 = vperm.xlu1 %3329, %v2338_v1  }
 0x855   : > { %v2223_v40 = vpop.f32.mrb[73].mxu1  ;;  %v2232_v12 = vadd.f32 %v3178_v55, %v4183_v42 }
 0x856   : > { %v3179_v63 = vpop.f32.mrb[74].mxu1  ;;  %2387 = vperm.xlu0 %3328, %v2341_v34   ;;  %v2224_v25 = vadd.f32 %v2223_v40, %v4183_v42 }
 0x857   : > { %v2226_v3 = vpop.f32.mrb[75].mxu1  ;;  %v2235_v10 = vadd.f32 %v3179_v63, %v4183_v42 }
 0x858   : > { %2278 = vrot.lane.b32.xlu1 %v2208_v5, %s3565_s11  ;;  %v2227_v23 = vadd.f32 %v2226_v3, %v4183_v42 }
 0x85a   : > { %2280 = vrot.lane.b32.xlu0 %v2211_v61, %s3565_s11 }
 0x85c   : > { %2382 = vperm.xlu1 %3329, %v2340_v11   ;;  %v3182_v8 = vpop.f32.mrb[76].mxu1 }
 0x85d   : > { %v2239_v39 = vpop.f32.mrb[77].mxu1  ;;  %v2248_v13 = vadd.f32 %v3182_v8, %v4183_v42 }
 0x85e   : > { %2284 = vrot.lane.b32.xlu0 %v2219_v58, %s3565_s11  ;;  %v3183_v19 = vpop.f32.mrb[78].mxu1  ;;  %v2240_v20 = vadd.f32 %v2239_v39, %v4183_v42 }
 0x85f   : > { %v2242_v6 = vpop.f32.mrb[79].mxu1  ;;  %v2251_v43 = vadd.f32 %v3183_v19, %v4183_v42 }
 0x860   : > { %2282 = vrot.lane.b32.xlu1 %v2216_v18, %s3565_s11  ;;  %v2243_v28 = vadd.f32 %v2242_v6, %v4183_v42 }
 0x862   : > { %2397 = vperm.xlu0 %3328, %v2343_v7  }
 0x864   : > { %2392 = vperm.xlu1 %3329, %v2342_v9  }
 0x866   : > { %2407 = vperm.xlu0 %3328, %v2345_v24  }
 0x868   : > { %2286 = vrot.lane.b32.xlu1 %v2224_v25, %s3565_s11 }
 0x86a   : > { %2288 = vrot.lane.b32.xlu0 %v2227_v23, %s3565_s11 }
 0x86c   : > { %2402 = vperm.xlu1 %3329, %v2344_v32  }
 0x86e   : > { %2292 = vrot.lane.b32.xlu0 %v2235_v10, %s3565_s11 }
 0x870   : > { %2290 = vrot.lane.b32.xlu1 %v2232_v12, %s3565_s11 }
 0x872   : > { %2417 = vperm.xlu0 %3328, %v2347_v31  }
 0x874   : > { %2412 = vperm.xlu1 %3329, %v2346_v35  }
 0x876   : > { %2296 = vrot.lane.b32.xlu0 %v2243_v28, %s3565_s11 }
 0x878   : > { %2294 = vrot.lane.b32.xlu1 %v2240_v20, %s3565_s11 }
 0x87a   : > { %2427 = vperm.xlu0 %3328, %v2349_v26  }
 0x87c   : > { %2422 = vperm.xlu1 %3329, %v2348_v54  }
 0x87e   : > { %2300 = vrot.lane.b32.xlu0 %v2251_v43, %s3565_s11 }
 0x880   : > { %2298 = vrot.lane.b32.xlu1 %v2248_v13, %s3565_s11 }
 0x8ba   : > { %v2271_v45 = vpop.permute.xlu1 %2270 }
 0x8bb   : > { %v2318_v33 = vmul.f32 %v2271_v45, %v4000_v52 }
 0x8bc   : > { %v2273_v48 = vpop.permute.xlu0 %2272 }
 0x8bd   : > { %v2319_v57 = vmul.f32 %v2273_v48, %v4002_v36  ;;  %v2430_v51 = vadd.f32 %v2353_v46, %v2318_v33 }
 0x8bf   : > { %v2431_v2 = vadd.f32 %v2358_v44, %v2319_v57 }
 0x8c0   : > { %v2277_v42 = vpop.permute.xlu0 %2276 }
 0x8c1   : > { %v3330_v62 = vpack.i.bf16 %v2431_v2, %v2430_v51  ;;  %v2321_v41 = vmul.f32 %v2277_v42, %v4010_v56 }
 0x8c3   : > { %3331 = vrot.lane.b32.xlu1 %v3330_v62, %s3567_s12  ;;  %v2433_v1 = vadd.f32 %v2368_v60, %v2321_v41 }
 0x8cb   : > { %v2363_v53 = vpop.permute.xlu1 %2362 }
 0x8cf   : > { %v2275_v59 = vpop.permute.xlu1 %2274 }
 0x8d0   : > { %v2320_v15 = vmul.f32 %v2275_v59, %v4006_v47 }
 0x8d1   : > { %v2378_v50 = vpop.permute.xlu0 %2377 }
 0x8d2   : > { %v2432_v55 = vadd.f32 %v2363_v53, %v2320_v15 }
 0x8d3   : > { %v2373_v52 = vpop.permute.xlu1 %2372 }
 0x8d4   : > { %v3335_v34 = vpack.i.bf16 %v2433_v1, %v2432_v55 }
 0x8d5   : > { %v2388_v40 = vpop.permute.xlu0 %2387 }
 0x8d6   : > { %3336 = vrot.lane.b32.xlu0 %v3335_v34, %s3567_s12 }
 0x8d7   : > { %v2279_v36 = vpop.permute.xlu1 %2278 }
 0x8d8   : > { %v2322_v5 = vmul.f32 %v2279_v36, %v4014_v0 }
 0x8d9   : > { %v2281_v63 = vpop.permute.xlu0 %2280 }
 0x8da   : > { %v2323_v3 = vmul.f32 %v2281_v63, %v4018_v22  ;;  %v2434_v11 = vadd.f32 %v2373_v52, %v2322_v5 }
 0x8db   : > { %v2383_v61 = vpop.permute.xlu1 %2382 }
 0x8dc   : > { %v2435_v56 = vadd.f32 %v2378_v50, %v2323_v3 }
 0x8dd   : > { %v2285_v58 = vpop.permute.xlu0 %2284 }
 0x8de   : > { %v2325_v47 = vmul.f32 %v2285_v58, %v4026_v16  ;;  %v3340_v8 = vpack.i.bf16 %v2435_v56, %v2434_v11 }
 0x8df   : > { %v2283_v39 = vpop.permute.xlu1 %2282 }
 0x8e0   : > { %v2324_v18 = vmul.f32 %v2283_v39, %v4022_v14  ;;  %3341 = vrot.lane.b32.xlu1 %v3340_v8, %s3567_s12  ;;  %v2437_v6 = vadd.f32 %v2388_v40, %v2325_v47 }
 0x8e1   : > { %v2398_v19 = vpop.permute.xlu0 %2397 }
 0x8e2   : > { %v2436_v7 = vadd.f32 %v2383_v61, %v2324_v18 }
 0x8e3   : > { %v2393_v9 = vpop.permute.xlu1 %2392 }
 0x8e4   : > { %v3345_v0 = vpack.i.bf16 %v2437_v6, %v2436_v7 }
 0x8e5   : > { %v2408_v24 = vpop.permute.xlu0 %2407 }
 0x8e6   : > { %3346 = vrot.lane.b32.xlu0 %v3345_v0, %s3567_s12 }
 0x8e7   : > { %v2287_v22 = vpop.permute.xlu1 %2286 }
 0x8e8   : > { %v2326_v25 = vmul.f32 %v2287_v22, %v4030_v17 }
 0x8e9   : > { %v2289_v23 = vpop.permute.xlu0 %2288 }
 0x8ea   : > { %v2327_v16 = vmul.f32 %v2289_v23, %v4034_v27  ;;  %v2438_v10 = vadd.f32 %v2393_v9, %v2326_v25 }
 0x8eb   : > { %v2403_v32 = vpop.permute.xlu1 %2402 }
 0x8ec   : > { %v2439_v12 = vadd.f32 %v2398_v19, %v2327_v16 }
 0x8ed   : > { %v2293_v14 = vpop.permute.xlu0 %2292 }
 0x8ee   : > { %v2329_v31 = vmul.f32 %v2293_v14, %v4042_v4  ;;  %v3350_v35 = vpack.i.bf16 %v2439_v12, %v2438_v10 }
 0x8ef   : > { %v2291_v28 = vpop.permute.xlu1 %2290 }
 0x8f0   : > { %v2328_v20 = vmul.f32 %v2291_v28, %v4038_v21  ;;  %3351 = vrot.lane.b32.xlu1 %v3350_v35, %s3567_s12  ;;  %v2441_v54 = vadd.f32 %v2408_v24, %v2329_v31 }
 0x8f1   : > { %v2418_v26 = vpop.permute.xlu0 %2417 }
 0x8f2   : > { %v2440_v43 = vadd.f32 %v2403_v32, %v2328_v20  ;;  %v3570_v32 = vmov 0.31622776  }
 0x8f3   : > { %v2413_v13 = vpop.permute.xlu1 %2412 }
 0x8f4   : > { %v3355_v17 = vpack.i.bf16 %v2441_v54, %v2440_v43 }
 0x8f5   : > { %v2297_v46 = vpop.permute.xlu0 %2296 }
 0x8f6   : > { %v2331_v27 = vmul.f32 %v2297_v46, %v4050_v30  ;;  %3356 = vrot.lane.b32.xlu0 %v3355_v17, %s3567_s12  ;;  %v3569_v30 = vmov 0.0  }
 0x8f7   : > { %v2295_v44 = vpop.permute.xlu1 %2294  ;;  %3216 = vmatprep.mubr.msk.f32.mxu0 %vm3568_vm3, %v3569_v30 }
 0x8f8   : > { %v2330_v60 = vmul.f32 %v2295_v44, %v4046_v29  ;;  %v2443_v45 = vadd.f32 %v2418_v26, %v2331_v27 }
 0x8f9   : > { %v2428_v4 = vpop.permute.xlu0 %2427 }
 0x8fa   : > { %v2442_v33 = vadd.f32 %v2413_v13, %v2330_v60 }
 0x8fb   : > { %v2423_v48 = vpop.permute.xlu1 %2422 }
 0x8fc   : > { %v3360_v21 = vpack.i.bf16 %v2443_v45, %v2442_v33 }
 0x8fd   : > { %v2301_v57 = vpop.permute.xlu0 %2300 }
 0x8fe   : > { %v2333_v51 = vmul.f32 %v2301_v57, %v4058_v38  ;;  %3361 = vrot.lane.b32.xlu1 %v3360_v21, %s3567_s12 }
 0x8ff   : > { %v2299_v2 = vpop.permute.xlu1 %2298 }
 0x900   : > { %v2332_v62 = vmul.f32 %v2299_v2, %v4054_v49  ;;  %v2445_v42 = vadd.f32 %v2428_v4, %v2333_v51 }
 0x902   : > { %v2444_v53 = vadd.f32 %v2423_v48, %v2332_v62 }
 0x904   : > { %v3365_v41 = vpack.i.bf16 %v2445_v42, %v2444_v53 }
 0x906   : > { %3366 = vrot.lane.b32.xlu0 %v3365_v41, %s3567_s12 }
 0x935   : > { %v3332_v29 = vpop.permute.xlu1 %3331 }
 0x936   : > { %v3334_v59 = vunpack.i.h.bf16 %v3332_v29  ;;  %v3333_v15 = vunpack.i.l.bf16 %v3332_v29 }
 0x938   : > { %v3220_v50 = vpack.c.bf16 %v3334_v59, %v3333_v15 }
 0x93a   : > { %3222 = vmatpush3.bf16.xpose.msk.msra.mxu0 %vm4257_vm5, %v3220_v50 }
 0x93b   : > { %3223 = vmatprep.subr.bf16.mxu0 %v3566_v37 }
 0x948   : > { %v3337_v49 = vpop.permute.xlu0 %3336 }
 0x949   : > { %v3339_v1 = vunpack.i.h.bf16 %v3337_v49  ;;  %v3338_v55 = vunpack.i.l.bf16 %v3337_v49 }
 0x94b   : > { %v3224_v52 = vpack.c.bf16 %v3339_v1, %v3338_v55 }
 0x94d   : > { %3226 = vmatpush3.bf16.xpose.msk.msra.mxu0 %vm4257_vm5, %v3224_v52 }
 0x94e   : > { %3227 = vmatprep.subr.bf16.mxu0 %v3566_v37 }
 0x952   : > { %v3342_v34 = vpop.permute.xlu1 %3341 }
 0x953   : > { %v3344_v40 = vunpack.i.h.bf16 %v3342_v34  ;;  %v3343_v36 = vunpack.i.l.bf16 %v3342_v34 }
 0x955   : > { %v3228_v5 = vpack.c.bf16 %v3344_v40, %v3343_v36 }
 0x957   : > { %3230 = vmatpush3.bf16.xpose.msk.msra.mxu0 %vm4257_vm5, %v3228_v5 }
 0x958   : > { %v3347_v63 = vpop.permute.xlu0 %3346  ;;  %3231 = vmatprep.subr.bf16.mxu0 %v3566_v37 }
 0x959   : > { %v3349_v3 = vunpack.i.h.bf16 %v3347_v63  ;;  %v3348_v61 = vunpack.i.l.bf16 %v3347_v63 }
 0x95b   : > { %v3232_v11 = vpack.c.bf16 %v3349_v3, %v3348_v61 }
 0x95f   : > { %3234 = vmatpush3.bf16.xpose.msk.msra.mxu0 %vm4257_vm5, %v3232_v11 }
 0x960   : > { %3235 = vmatprep.subr.bf16.mxu0 %v3566_v37 }
 0x962   : > { %v3352_v56 = vpop.permute.xlu1 %3351 }
 0x963   : > { %v3354_v58 = vunpack.i.h.bf16 %v3352_v56  ;;  %v3353_v47 = vunpack.i.l.bf16 %v3352_v56 }
 0x965   : > { %v3236_v8 = vpack.c.bf16 %v3354_v58, %v3353_v47 }
 0x967   : > { %3238 = vmatpush3.bf16.xpose.msk.msra.mxu0 %vm4257_vm5, %v3236_v8 }
 0x968   : > { %v3357_v39 = vpop.permute.xlu0 %3356  ;;  %3239 = vmatprep.subr.bf16.mxu0 %v3566_v37 }
 0x969   : > { %v3359_v18 = vunpack.i.h.bf16 %v3357_v39  ;;  %v3358_v19 = vunpack.i.l.bf16 %v3357_v39 }
 0x96b   : > { %v3240_v6 = vpack.c.bf16 %v3359_v18, %v3358_v19 }
 0x96f   : > { %3242 = vmatpush3.bf16.xpose.msk.msra.mxu0 %vm4257_vm5, %v3240_v6 }
 0x970   : > { %v3362_v7 = vpop.permute.xlu1 %3361  ;;  %3243 = vmatprep.subr.bf16.mxu0 %v3566_v37 }
 0x971   : > { %v3364_v9 = vunpack.i.h.bf16 %v3362_v7  ;;  %v3363_v0 = vunpack.i.l.bf16 %v3362_v7 }
 0x973   : > { %v3244_v24 = vpack.c.bf16 %v3364_v9, %v3363_v0 }
 0x977   : > { %3246 = vmatpush3.bf16.xpose.msk.msra.mxu0 %vm4257_vm5, %v3244_v24 }
 0x978   : > { %v3367_v22 = vpop.permute.xlu0 %3366  ;;  %3247 = vmatprep.subr.bf16.mxu0 %v3566_v37 }
 0x979   : > { %v3369_v25 = vunpack.i.h.bf16 %v3367_v22  ;;  %v3368_v23 = vunpack.i.l.bf16 %v3367_v22 }
 0x97b   : > { %v3248_v16 = vpack.c.bf16 %v3369_v25, %v3368_v23 }
 0x97f   : > { %3250 = vmatpush3.bf16.xpose.msk.msra.mxu0 %vm4257_vm5, %v3248_v16 }
 0x986   : > { %3217 = vmatmul.mubr.msk.f32.vlgmr.msra.gmra.mrb[48].mxu0 %vm2494_vm4, %v3570_v32 }
 0xa59   : > { %v2596_v37 = vpop.f32.mrb[48].mxu0 }
 0xa5a   : > { %2600 = vst [vmem:[%s260_s13] sm:$0x1] %v2596_v37  ;;  %v3218_v10 = vpop.f32.mrb[49].mxu0 }
 0xa5b   : > { %3496 = shalt.err (!%p3493_p11)
}
 0xa5c   : > { %s3497_s30 = scalar_lea.hbm %s4292_s27, 16  ;;  %s3501_s9 = scalar_lea.hbm %s4336_s4, 32 }
 0xa5d   : > { %p3498_p13 = scmp.ne.s32.totalorder %s4292_s27, %s3497_s30  ;;  %p3502_p6 = scmp.lt.u32.totalorder %s4292_s27, %s4336_s4 }
 0xa5e   : > { %p3503_p9 = scmp.lt.u32.totalorder %s3501_s9, %s3497_s30  ;;  %p3505_p10 = scmp.lt.u32.totalorder %s3497_s30, %s4292_s27 }
 0xa5f   : > { %p3499_p0 = pnand %p3498_p13, %p4351_p1 }
 0xa60   : > { %p3504_p12 = por %p3503_p9, %p3502_p6 }
 0xa61   : > { %p3500_p5 = pneg %p3499_p0 }
 0xa62   : > { %p3506_p2 = por %p3505_p10, %p3504_p12 }
 0xa64   : > { %p3507_p3 = pnand %p3506_p2, %p3500_p5 }
 0xa66   : > { %3510 = shalt.err (!%p3507_p3)
}
 0xa67   : > { %3260 = dma.vmem_to_hbm [thread:$0]  (%p4351_p1), %s4286_s14, 16, %s4292_s27, %s2602_s6  }
 0xa68 PF: > { %p3277_p4 = scmp.ge.s32.totalorder %s3553_s18, 2  ;;  %s2626_s12 = sand.u32 1, %s3541_s15  }
 0xa69   : > { %p4352_p7 = scmp.ne.s32.totalorder %s4341_s26, 0  ;;  %s2627_s29 = scalar_lea.sflag [#allocation4], %s2626_s12 }
 0xa6b   : > { %p3270_p8 = pnand %p3277_p4, %p4352_p7 }
 0xa6d   : > { %3536 = dma.done.wait (!%p3270_p8), %s2627_s29, 16  }
 0xa6e   : > { %3538 = vsyncadd (!%p3270_p8), %s2627_s29, 4294967280  ;;  %p16_p11 = scmp.ge.s32.totalorder %s3622_s21, 4   ;;  %s4353_s15 = smov %s3545_s16 }
 0xa6f   : > { %s4354_s16 = smov %s3549_s17  ;;  %s4355_s17 = smov %s3633_s24 }
 0xa70   : > { %s4356_s18 = smov %s3622_s21  ;;  %18 = sbr.rel (!%p16_p11) target bundleno = 5 (0x5), region = 83 }
 0xa77   :  { %2631 = vsyncpa [#allocation3], 1 }
 0xa78   :  { %2633 = vsyncpa [#allocation3 + $0x1], 1 }
 0xa79   :  { %2634 = vsyncpa [#allocation6], 1 }
 0xa7a   :  { %2635 = vsyncpa [#allocation4], 1 }
 0xa7b   :  { %2637 = vsyncpa [#allocation4 + $0x1], 1 }

</bundles_post_ra>
